<compile_context>
chip_gen: v7x
topology: tpu7x:2x2x1
jax: 0.10.0
libtpu: 0.0.40
codegen_flags: <defaults>
</compile_context>

<pallas_src>
import jax
import jax.numpy as jnp
from jax.experimental import pallas as pl
from jax.experimental.pallas import tpu as pltpu

INPUT_DIM = 784
HIDDEN_DIM = 256
CODE_DIM = 64

# Lane-dense padded feature dims (multiples of 128 lanes) -> unmasked full-lane stores
# and 128-aligned MXU K/N dims.  Zero padding keeps the math exact.
IN_PAD = 896      # 7 * 128
CODE_PAD = 128    # 1 * 128

MIN_TILE_B = 16        # bf16 sublane packing for the batch (second-to-last) dim
DEFAULT_TILE_B = 1024  # target rows per grid step (amortizes ~0.35 us per-step overhead)
VMEM_LIMIT_BYTES = 32 * 1024 * 1024


def _round_up(x: int, m: int) -> int:
    return (x + m - 1) // m * m


def _cdiv(a: int, b: int) -> int:
    return -(-a // b)


def _choose_tiling(B: int, target: int):
    """Balanced batch tiling: minimal padding, and >=2 tiles so v7x's 2 TCs both work."""
    n_tiles = max(1, _cdiv(B, max(target, MIN_TILE_B)))
    if n_tiles == 1 and B > MIN_TILE_B:
        n_tiles = 2  # feed both TensorCores on v7x; ~0.35 us extra per step elsewhere
    tile_b = _round_up(_cdiv(B, n_tiles), MIN_TILE_B)
    return n_tiles, tile_b


def _ae_kernel(x_ref,
               w1_ref, b1_ref,
               w2_ref, b2_ref,
               w3_ref, b3_ref,
               w4_ref, b4_ref,
               recon_ref, code_ref):
    """One batch tile: 4 fused matmuls (bf16 in, f32 acc) + ReLU / sigmoid epilogues."""
    x = x_ref[...]                                             # (TILE_B, IN_PAD) bf16

    # Encoder: Linear(784->256) + ReLU
    h1 = jnp.dot(x, w1_ref[...], preferred_element_type=jnp.float32) + b1_ref[...]
    h1 = jnp.maximum(h1, 0.0)

    # Encoder: Linear(256->64) + ReLU -> code (padded to 128 lanes; extra lanes exactly 0)
    code = jnp.dot(h1.astype(jnp.bfloat16), w2_ref[...],
                   preferred_element_type=jnp.float32) + b2_ref[...]
    code = jnp.maximum(code, 0.0)

    # Decoder: Linear(64->256) + ReLU
    h2 = jnp.dot(code.astype(jnp.bfloat16), w3_ref[...],
                 preferred_element_type=jnp.float32) + b3_ref[...]
    h2 = jnp.maximum(h2, 0.0)

    # Decoder: Linear(256->784) + Sigmoid -> reconstruction
    logits = jnp.dot(h2.astype(jnp.bfloat16), w4_ref[...],
                     preferred_element_type=jnp.float32) + b4_ref[...]
    # sigmoid(x) = 0.5 * tanh(0.5 x) + 0.5 : single EUP op, VALU mul/add, stays in [0, 1].
    recon = 0.5 * jnp.tanh(0.5 * logits) + 0.5

    recon_ref[...] = recon.astype(recon_ref.dtype)             # bf16 store, full lanes
    code_ref[...] = code.astype(code_ref.dtype)                # bf16 store, full lanes


def _pad_params(params):
    """Zero-pad weights/biases to lane-dense padded dims; weights bf16, biases f32."""
    (w1, b1), (w2, b2), (w3, b3), (w4, b4) = params
    w1p = jnp.pad(w1, ((0, IN_PAD - INPUT_DIM), (0, 0))).astype(jnp.bfloat16)      # (896, 256)
    b1p = b1.astype(jnp.float32)                                                   # (1, 256)
    w2p = jnp.pad(w2, ((0, 0), (0, CODE_PAD - CODE_DIM))).astype(jnp.bfloat16)     # (256, 128)
    b2p = jnp.pad(b2, ((0, 0), (0, CODE_PAD - CODE_DIM))).astype(jnp.float32)      # (1, 128)
    w3p = jnp.pad(w3, ((0, CODE_PAD - CODE_DIM), (0, 0))).astype(jnp.bfloat16)     # (128, 256)
    b3p = b3.astype(jnp.float32)                                                   # (1, 256)
    w4p = jnp.pad(w4, ((0, 0), (0, IN_PAD - INPUT_DIM))).astype(jnp.bfloat16)      # (256, 896)
    b4p = jnp.pad(b4, ((0, 0), (0, IN_PAD - INPUT_DIM))).astype(jnp.float32)       # (1, 896)
    return w1p, b1p, w2p, b2p, w3p, b3p, w4p, b4p


def autoencoder_forward(x, params, *, tile_b: int = DEFAULT_TILE_B, return_padded: bool = False):
    """Forward pass of the autoencoder.

    x: any shape that flattens to (-1, 784).
    Returns (reconstructed, code) as bf16.
      return_padded=False (default): shapes (B, 784) and (B, 64)  -- matches the PyTorch module.
      return_padded=True: padded (B_pad, 896) / (B_pad, 128) arrays with NO extra slice pass;
        rows >= B and lanes >= 784 / >= 64 must be masked/ignored by the caller.
    """
    x2d = x.reshape(-1, INPUT_DIM)
    if x2d.dtype != jnp.bfloat16:
        x2d = x2d.astype(jnp.bfloat16)        # single cast; fused with the pad below by XLA
    B = x2d.shape[0]

    num_tiles, tile_b = _choose_tiling(B, tile_b)
    B_pad = num_tiles * tile_b

    xp = jnp.pad(x2d, ((0, B_pad - B), (0, IN_PAD - INPUT_DIM)))   # bf16, one pass
    w1p, b1p, w2p, b2p, w3p, b3p, w4p, b4p = _pad_params(params)

    def resident(shape):
        # Constant index_map: same block every grid step -> Pallas keeps it VMEM-resident
        # and never re-issues the DMA after the first step.
        return pl.BlockSpec(shape, lambda i: (0, 0))

    flops = 2 * B_pad * (IN_PAD * HIDDEN_DIM + HIDDEN_DIM * CODE_PAD
                         + CODE_PAD * HIDDEN_DIM + HIDDEN_DIM * IN_PAD)
    transcendentals = B_pad * IN_PAD  # one tanh per decoder output element
    weight_bytes = sum(int(a.size) * a.dtype.itemsize
                       for a in (w1p, b1p, w2p, b2p, w3p, b3p, w4p, b4p))
    bytes_accessed = (int(xp.size) * 2          # bf16 input stream
                      + B_pad * IN_PAD * 2      # bf16 recon stream
                      + B_pad * CODE_PAD * 2    # bf16 code stream
                      + weight_bytes)

    recon_p, code_p = pl.pallas_call(
        _ae_kernel,
        grid=(num_tiles,),
        in_specs=[
            pl.BlockSpec((tile_b, IN_PAD), lambda i: (i, 0)),   # x tile, double-buffered
            resident((IN_PAD, HIDDEN_DIM)), resident((1, HIDDEN_DIM)),
            resident((HIDDEN_DIM, CODE_PAD)), resident((1, CODE_PAD)),
            resident((CODE_PAD, HIDDEN_DIM)), resident((1, HIDDEN_DIM)),
            resident((HIDDEN_DIM, IN_PAD)), resident((1, IN_PAD)),
        ],
        out_specs=(
            pl.BlockSpec((tile_b, IN_PAD), lambda i: (i, 0)),
            pl.BlockSpec((tile_b, CODE_PAD), lambda i: (i, 0)),
        ),
        out_shape=(
            jax.ShapeDtypeStruct((B_pad, IN_PAD), jnp.bfloat16),
            jax.ShapeDtypeStruct((B_pad, CODE_PAD), jnp.bfloat16),
        ),
        compiler_params=pltpu.CompilerParams(
            dimension_semantics=("parallel",),       # lets v7x shard tiles across its 2 TCs
            vmem_limit_bytes=VMEM_LIMIT_BYTES,       # headroom for the 1024-row tile on v5e
        ),
        cost_estimate=pl.CostEstimate(flops=flops,
                                      transcendentals=transcendentals,
                                      bytes_accessed=bytes_accessed),
    )(xp, w1p, b1p, w2p, b2p, w3p, b3p, w4p, b4p)

    if return_padded:
        # NOTE: rows >= B contain sigmoid(bias-chain) garbage; caller must mask them.
        return recon_p, code_p
    return recon_p[:B, :INPUT_DIM], code_p[:B, :CODE_DIM]


def init_params(key):
    """PyTorch-style Linear init U(-1/sqrt(fan_in), 1/sqrt(fan_in)); weights stored (in, out)."""
    dims = [(INPUT_DIM, HIDDEN_DIM),   # encoder.0
            (HIDDEN_DIM, CODE_DIM),    # encoder.2
            (CODE_DIM, HIDDEN_DIM),    # decoder.0
            (HIDDEN_DIM, INPUT_DIM)]   # decoder.2
    params = []
    for (fan_in, fan_out) in dims:
        key, kw, kb = jax.random.split(key, 3)
        bound = 1.0 / (fan_in ** 0.5)
        w = jax.random.uniform(kw, (fan_in, fan_out), jnp.float32, -bound, bound)
        b = jax.random.uniform(kb, (1, fan_out), jnp.float32, -bound, bound)
        params.append((w, b))
    return params


def _reference_forward(x, params):
    """Pure-JAX f32 reference for correctness checking."""
    x2d = x.reshape(-1, INPUT_DIM).astype(jnp.float32)
    (w1, b1), (w2, b2), (w3, b3), (w4, b4) = params
    h1 = jnp.maximum(x2d @ w1 + b1, 0.0)
    code = jnp.maximum(h1 @ w2 + b2, 0.0)
    h2 = jnp.maximum(code @ w3 + b3, 0.0)
    recon = jax.nn.sigmoid(h2 @ w4 + b4)
    return recon, code


if __name__ == "__main__":
    key = jax.random.PRNGKey(0)
    key, kx = jax.random.split(key)
    # Small MNIST-like batch: (B, 1, 28, 28) -> flattened to (B, 784) inside the wrapper.
    x = jax.random.uniform(kx, (8, 1, 28, 28), jnp.float32)
    params = init_params(key)

    recon, code = autoencoder_forward(x, params)
    recon = jax.block_until_ready(recon)
    code = jax.block_until_ready(code)

    ref_recon, ref_code = _reference_forward(x, params)
    assert recon.shape == (8, INPUT_DIM) and code.shape == (8, CODE_DIM)

    recon_f32 = recon.astype(jnp.float32)
    code_f32 = code.astype(jnp.float32)
    # bf16 matmuls + bf16 outputs: compare against the f32 reference with a loose tolerance.
    assert jnp.allclose(recon_f32, ref_recon, atol=3e-2, rtol=3e-2), \
        float(jnp.max(jnp.abs(recon_f32 - ref_recon)))
    assert jnp.allclose(code_f32, ref_code, atol=3e-2, rtol=3e-2), \
        float(jnp.max(jnp.abs(code_f32 - ref_code)))
    # Sigmoid-via-tanh epilogue must stay inside [0, 1].
    assert float(jnp.min(recon_f32)) >= 0.0 and float(jnp.max(recon_f32)) <= 1.0

    print("KERNEL_OK")
</pallas_src>

<mosaic_0001>
module attributes {stable_mosaic.version = 11 : i64} {
  func.func @_ae_kernel(%arg0: i32, %arg1: memref<16x896xbf16, #tpu.memory_space<vmem>>, %arg2: memref<896x256xbf16, #tpu.memory_space<vmem>>, %arg3: memref<1x256xf32, #tpu.memory_space<vmem>>, %arg4: memref<256x128xbf16, #tpu.memory_space<vmem>>, %arg5: memref<1x128xf32, #tpu.memory_space<vmem>>, %arg6: memref<128x256xbf16, #tpu.memory_space<vmem>>, %arg7: memref<1x256xf32, #tpu.memory_space<vmem>>, %arg8: memref<256x896xbf16, #tpu.memory_space<vmem>>, %arg9: memref<1x896xf32, #tpu.memory_space<vmem>>, %arg10: memref<16x896xbf16, #tpu.memory_space<vmem>>, %arg11: memref<16x128xbf16, #tpu.memory_space<vmem>>) attributes {dimension_semantics = [#tpu.dimension_semantics<parallel>], iteration_bounds = array<i64: 1>, scalar_prefetch = 0 : i64, scratch_operands = 0 : i64, tpu.core_type = #tpu.core_type<tc>, window_params = [{transform_indices = @transform_0, window_bounds = array<i64: 16, 896>}, {pipeline_mode = #tpu.pipeline_mode<synchronous>, transform_indices = @transform_1, window_bounds = array<i64: 896, 256>}, {pipeline_mode = #tpu.pipeline_mode<synchronous>, transform_indices = @transform_2, window_bounds = array<i64: 1, 256>}, {pipeline_mode = #tpu.pipeline_mode<synchronous>, transform_indices = @transform_3, window_bounds = array<i64: 256, 128>}, {pipeline_mode = #tpu.pipeline_mode<synchronous>, transform_indices = @transform_4, window_bounds = array<i64: 1, 128>}, {pipeline_mode = #tpu.pipeline_mode<synchronous>, transform_indices = @transform_5, window_bounds = array<i64: 128, 256>}, {pipeline_mode = #tpu.pipeline_mode<synchronous>, transform_indices = @transform_6, window_bounds = array<i64: 1, 256>}, {pipeline_mode = #tpu.pipeline_mode<synchronous>, transform_indices = @transform_7, window_bounds = array<i64: 256, 896>}, {pipeline_mode = #tpu.pipeline_mode<synchronous>, transform_indices = @transform_8, window_bounds = array<i64: 1, 896>}, {transform_indices = @transform_9, window_bounds = array<i64: 16, 896>}, {transform_indices = @transform_10, window_bounds = array<i64: 16, 128>}]} {
    %c0 = arith.constant 0 : index
    %c0_0 = arith.constant 0 : index
    %0 = vector.load %arg1[%c0, %c0_0] : memref<16x896xbf16, #tpu.memory_space<vmem>>, vector<16x896xbf16>
    %c0_1 = arith.constant 0 : index
    %c0_2 = arith.constant 0 : index
    %1 = vector.load %arg2[%c0_1, %c0_2] : memref<896x256xbf16, #tpu.memory_space<vmem>>, vector<896x256xbf16>
    %cst = arith.constant dense<0.000000e+00> : vector<16x256xf32>
    %2 = tpu.matmul %0, %1, %cst {dimension_numbers = #tpu.dot_dimension_numbers<[1], [0], [0], [1], [0, 0, 1, 1], [], []>} : vector<16x896xbf16>, vector<896x256xbf16>, vector<16x256xf32> -> vector<16x256xf32>
    %c0_3 = arith.constant 0 : index
    %c0_4 = arith.constant 0 : index
    %3 = vector.load %arg3[%c0_3, %c0_4] : memref<1x256xf32, #tpu.memory_space<vmem>>, vector<1x256xf32>
    %4 = vector.broadcast %3 : vector<1x256xf32> to vector<16x256xf32>
    %5 = arith.addf %2, %4 : vector<16x256xf32>
    %cst_5 = arith.constant 0.000000e+00 : f32
    %6 = vector.broadcast %cst_5 : f32 to vector<16x256xf32>
    %7 = arith.maximumf %5, %6 : vector<16x256xf32>
    %8 = arith.truncf %7 : vector<16x256xf32> to vector<16x256xbf16>
    %c0_6 = arith.constant 0 : index
    %c0_7 = arith.constant 0 : index
    %9 = vector.load %arg4[%c0_6, %c0_7] : memref<256x128xbf16, #tpu.memory_space<vmem>>, vector<256x128xbf16>
    %cst_8 = arith.constant dense<0.000000e+00> : vector<16x128xf32>
    %10 = tpu.matmul %8, %9, %cst_8 {dimension_numbers = #tpu.dot_dimension_numbers<[1], [0], [0], [1], [0, 0, 1, 1], [], []>} : vector<16x256xbf16>, vector<256x128xbf16>, vector<16x128xf32> -> vector<16x128xf32>
    %c0_9 = arith.constant 0 : index
    %c0_10 = arith.constant 0 : index
    %11 = vector.load %arg5[%c0_9, %c0_10] : memref<1x128xf32, #tpu.memory_space<vmem>>, vector<1x128xf32>
    %12 = vector.broadcast %11 : vector<1x128xf32> to vector<16x128xf32>
    %13 = arith.addf %10, %12 : vector<16x128xf32>
    %cst_11 = arith.constant 0.000000e+00 : f32
    %14 = vector.broadcast %cst_11 : f32 to vector<16x128xf32>
    %15 = arith.maximumf %13, %14 : vector<16x128xf32>
    %16 = arith.truncf %15 : vector<16x128xf32> to vector<16x128xbf16>
    %c0_12 = arith.constant 0 : index
    %c0_13 = arith.constant 0 : index
    %17 = vector.load %arg6[%c0_12, %c0_13] : memref<128x256xbf16, #tpu.memory_space<vmem>>, vector<128x256xbf16>
    %cst_14 = arith.constant dense<0.000000e+00> : vector<16x256xf32>
    %18 = tpu.matmul %16, %17, %cst_14 {dimension_numbers = #tpu.dot_dimension_numbers<[1], [0], [0], [1], [0, 0, 1, 1], [], []>} : vector<16x128xbf16>, vector<128x256xbf16>, vector<16x256xf32> -> vector<16x256xf32>
    %c0_15 = arith.constant 0 : index
    %c0_16 = arith.constant 0 : index
    %19 = vector.load %arg7[%c0_15, %c0_16] : memref<1x256xf32, #tpu.memory_space<vmem>>, vector<1x256xf32>
    %20 = vector.broadcast %19 : vector<1x256xf32> to vector<16x256xf32>
    %21 = arith.addf %18, %20 : vector<16x256xf32>
    %cst_17 = arith.constant 0.000000e+00 : f32
    %22 = vector.broadcast %cst_17 : f32 to vector<16x256xf32>
    %23 = arith.maximumf %21, %22 : vector<16x256xf32>
    %24 = arith.truncf %23 : vector<16x256xf32> to vector<16x256xbf16>
    %c0_18 = arith.constant 0 : index
    %c0_19 = arith.constant 0 : index
    %25 = vector.load %arg8[%c0_18, %c0_19] : memref<256x896xbf16, #tpu.memory_space<vmem>>, vector<256x896xbf16>
    %cst_20 = arith.constant dense<0.000000e+00> : vector<16x896xf32>
    %26 = tpu.matmul %24, %25, %cst_20 {dimension_numbers = #tpu.dot_dimension_numbers<[1], [0], [0], [1], [0, 0, 1, 1], [], []>} : vector<16x256xbf16>, vector<256x896xbf16>, vector<16x896xf32> -> vector<16x896xf32>
    %c0_21 = arith.constant 0 : index
    %c0_22 = arith.constant 0 : index
    %27 = vector.load %arg9[%c0_21, %c0_22] : memref<1x896xf32, #tpu.memory_space<vmem>>, vector<1x896xf32>
    %28 = vector.broadcast %27 : vector<1x896xf32> to vector<16x896xf32>
    %29 = arith.addf %26, %28 : vector<16x896xf32>
    %cst_23 = arith.constant 5.000000e-01 : f32
    %30 = vector.broadcast %cst_23 : f32 to vector<16x896xf32>
    %31 = arith.mulf %30, %29 : vector<16x896xf32>
    %32 = math.tanh %31 : vector<16x896xf32>
    %cst_24 = arith.constant 5.000000e-01 : f32
    %33 = vector.broadcast %cst_24 : f32 to vector<16x896xf32>
    %34 = arith.mulf %33, %32 : vector<16x896xf32>
    %cst_25 = arith.constant 5.000000e-01 : f32
    %35 = vector.broadcast %cst_25 : f32 to vector<16x896xf32>
    %36 = arith.addf %34, %35 : vector<16x896xf32>
    %37 = arith.truncf %36 : vector<16x896xf32> to vector<16x896xbf16>
    %c0_26 = arith.constant 0 : index
    %c0_27 = arith.constant 0 : index
    %38 = vector.load %arg10[%c0_26, %c0_27] : memref<16x896xbf16, #tpu.memory_space<vmem>>, vector<16x896xbf16>
    tpu.vector_store %arg10[%c0_26, %c0_27], %37 {strides = array<i32>} : memref<16x896xbf16, #tpu.memory_space<vmem>>, vector<16x896xbf16>,
    %39 = arith.truncf %15 : vector<16x128xf32> to vector<16x128xbf16>
    %c0_28 = arith.constant 0 : index
    %c0_29 = arith.constant 0 : index
    %40 = vector.load %arg11[%c0_28, %c0_29] : memref<16x128xbf16, #tpu.memory_space<vmem>>, vector<16x128xbf16>
    tpu.vector_store %arg11[%c0_28, %c0_29], %39 {strides = array<i32>} : memref<16x128xbf16, #tpu.memory_space<vmem>>, vector<16x128xbf16>,
    return
  }
  func.func @transform_0(%arg0: i32) -> (i32, i32) {
    %c0_i32 = arith.constant 0 : i32
    %c0_i32_0 = arith.constant 0 : i32
    return %arg0, %c0_i32 : i32, i32
  }
  func.func @transform_1(%arg0: i32) -> (i32, i32) {
    %c0_i32 = arith.constant 0 : i32
    %c0_i32_0 = arith.constant 0 : i32
    %c0_i32_1 = arith.constant 0 : i32
    return %c0_i32, %c0_i32_0 : i32, i32
  }
  func.func @transform_2(%arg0: i32) -> (i32, i32) {
    %c0_i32 = arith.constant 0 : i32
    %c0_i32_0 = arith.constant 0 : i32
    %c0_i32_1 = arith.constant 0 : i32
    return %c0_i32, %c0_i32_0 : i32, i32
  }
  func.func @transform_3(%arg0: i32) -> (i32, i32) {
    %c0_i32 = arith.constant 0 : i32
    %c0_i32_0 = arith.constant 0 : i32
    %c0_i32_1 = arith.constant 0 : i32
    return %c0_i32, %c0_i32_0 : i32, i32
  }
  func.func @transform_4(%arg0: i32) -> (i32, i32) {
    %c0_i32 = arith.constant 0 : i32
    %c0_i32_0 = arith.constant 0 : i32
    %c0_i32_1 = arith.constant 0 : i32
    return %c0_i32, %c0_i32_0 : i32, i32
  }
  func.func @transform_5(%arg0: i32) -> (i32, i32) {
    %c0_i32 = arith.constant 0 : i32
    %c0_i32_0 = arith.constant 0 : i32
    %c0_i32_1 = arith.constant 0 : i32
    return %c0_i32, %c0_i32_0 : i32, i32
  }
  func.func @transform_6(%arg0: i32) -> (i32, i32) {
    %c0_i32 = arith.constant 0 : i32
    %c0_i32_0 = arith.constant 0 : i32
    %c0_i32_1 = arith.constant 0 : i32
    return %c0_i32, %c0_i32_0 : i32, i32
  }
  func.func @transform_7(%arg0: i32) -> (i32, i32) {
    %c0_i32 = arith.constant 0 : i32
    %c0_i32_0 = arith.constant 0 : i32
    %c0_i32_1 = arith.constant 0 : i32
    return %c0_i32, %c0_i32_0 : i32, i32
  }
  func.func @transform_8(%arg0: i32) -> (i32, i32) {
    %c0_i32 = arith.constant 0 : i32
    %c0_i32_0 = arith.constant 0 : i32
    %c0_i32_1 = arith.constant 0 : i32
    return %c0_i32, %c0_i32_0 : i32, i32
  }
  func.func @transform_9(%arg0: i32) -> (i32, i32) {
    %c0_i32 = arith.constant 0 : i32
    %c0_i32_0 = arith.constant 0 : i32
    return %arg0, %c0_i32 : i32, i32
  }
  func.func @transform_10(%arg0: i32) -> (i32, i32) {
    %c0_i32 = arith.constant 0 : i32
    %c0_i32_0 = arith.constant 0 : i32
    return %arg0, %c0_i32 : i32, i32
  }
}

</mosaic_0001>

<bundles_post_ra>
// kernel: tpu_custom_call.1
= control target key start
LH: loop header
LB: loop body
LE: loop exit
PB: predicated region body
PF: predicated region fallthrough
CT: control target
= control target key end

     0   :  { %16 = vsyncpa [#allocation3], 0  ;;  %s3565_s0 = inlined_call_operand.hbm [shape: bf16[16,896], index: 0, kind: input, shape index: {}]   ;;  %s3566_s1 = inlined_call_operand.hbm [shape: bf16[896,256], index: 1, kind: input, shape index: {}]   ;;  %s3567_s2 = inlined_call_operand.vmem [shape: f32[1,256], index: 2, kind: input, shape index: {}]   ;;  %s3568_s3 = inlined_call_operand.hbm [shape: bf16[256,128], index: 3, kind: input, shape index: {}]   ;;  %s3569_s4 = inlined_call_operand.vmem [shape: f32[1,128], index: 4, kind: input, shape index: {}]   ;;  %s3570_s5 = inlined_call_operand.hbm [shape: bf16[128,256], index: 5, kind: input, shape index: {}]   ;;  %s3571_s6 = inlined_call_operand.vmem [shape: f32[1,256], index: 6, kind: input, shape index: {}]   ;;  %s3572_s7 = inlined_call_operand.hbm [shape: bf16[256,896], index: 7, kind: input, shape index: {}]   ;;  %s3573_s8 = inlined_call_operand.vmem [shape: f32[1,896], index: 8, kind: input, shape index: {}]   ;;  %s3574_s9 = inlined_call_operand.hbm [shape: bf16[16,896], index: 9, kind: output, shape index: {0}]   ;;  %s3575_s10 = inlined_call_operand.hbm [shape: bf16[16,128], index: 10, kind: output, shape index: {1}]  }
   0x1   :  { %17 = vsyncpa [#allocation6], 0 }
   0x2   :  { %18 = vsyncpa [#allocation9], 0 }
   0x3   :  { %19 = vsyncpa [#allocation4], 0 }
   0x4   :  { %20 = vsyncpa [#allocation13], 0  ;;  %s3343_s13 = smov [#allocation5]   ;;  %s3179_s17 = scalar_lea.hbm %s3566_s1, 14336 }
   0x5   :  { %s38_s14 = sshll.u32 %s3343_s13, 4  ;;  %p3180_p0 = scmp.ne.s32.totalorder %s3566_s1, %s3179_s17  ;;  %s39_s14 = int_to_ptr.vmem [resolvable:$true] %s38_s14 }
   0x6   :  { %p3183_p1 = scmp.lt.u32.totalorder %s3179_s17, %s3566_s1 }
   0x8   :  { %p3185_p2 = pnand %p3183_p1, %p3180_p0 }
   0xa   :  { %3188 = shalt.err (!%p3185_p2)
}
   0xb   :  { %s3189_s22 = scalar_lea.vmem %s39_s14, 14336  ;;  %p3194_p4 = scmp.lt.s32.totalorder %s39_s14, %s39_s14 }
   0xc   :  { %p3190_p3 = scmp.ne.s32.totalorder %s39_s14, %s3189_s22  ;;  %p3195_p5 = scmp.lt.s32.totalorder %s3189_s22, %s3189_s22 }
   0xe   :  { %p3196_p6 = por %p3195_p5, %p3194_p4 }
  0x10   :  { %p3197_p7 = pnand %p3196_p6, %p3190_p3 }
  0x12   :  { %3200 = shalt.err (!%p3197_p7)
}
  0x13   :  { %s3344_s23 = smov 128   ;;  %s3345_s24 = smov 8  }
  0x14   :  { %44 = dma.hbm_to_vmem [thread:$0]  %s3566_s1, 14336, %s39_s14, [#allocation6], %s3344_s23, %s3344_s23, %s3345_s24  }
  0x15   :  { %s3346_s27 = smov [#allocation8]   ;;  %s3347_s29 = smov [#allocation2]  }
  0x16   :  { %s66_s28 = sshll.u32 %s3346_s27, 4  ;;  %s26_s30 = sshll.u32 %s3347_s29, 4  ;;  %s67_s28 = int_to_ptr.vmem [resolvable:$true] %s66_s28  ;;  %s27_s30 = int_to_ptr.vmem [resolvable:$true] %s26_s30 }
  0x17   :  { %s3201_s13 = scalar_lea.hbm %s3570_s5, 2048 }
  0x18   :  { %p3202_p8 = scmp.ne.s32.totalorder %s3570_s5, %s3201_s13  ;;  %p3205_p9 = scmp.lt.u32.totalorder %s3201_s13, %s3570_s5 }
  0x1a   :  { %p3207_p10 = pnand %p3205_p9, %p3202_p8 }
  0x1c   :  { %3210 = shalt.err (!%p3207_p10)
}
  0x1d   :  { %s3211_s1 = scalar_lea.vmem %s67_s28, 2048  ;;  %p3216_p12 = scmp.lt.s32.totalorder %s67_s28, %s67_s28 }
  0x1e   :  { %p3212_p11 = scmp.ne.s32.totalorder %s67_s28, %s3211_s1  ;;  %p3217_p13 = scmp.lt.s32.totalorder %s3211_s1, %s3211_s1 }
  0x20   :  { %p3218_p0 = por %p3217_p13, %p3216_p12 }
  0x22   :  { %p3219_p1 = pnand %p3218_p0, %p3212_p11 }
  0x24   :  { %3222 = shalt.err (!%p3219_p1)
}
  0x25   :  { %72 = dma.hbm_to_vmem [thread:$0]  %s3570_s5, 2048, %s67_s28, [#allocation9], %s3344_s23, %s3344_s23, %s3345_s24  }
  0x26   :  { %s3223_s22 = scalar_lea.hbm %s3565_s0, 896 }
  0x27   :  { %p3224_p2 = scmp.ne.s32.totalorder %s3565_s0, %s3223_s22  ;;  %p3227_p3 = scmp.lt.u32.totalorder %s3223_s22, %s3565_s0 }
  0x29   :  { %p3229_p4 = pnand %p3227_p3, %p3224_p2 }
  0x2b   :  { %3232 = shalt.err (!%p3229_p4)
}
  0x2c   :  { %s3233_s11 = scalar_lea.vmem %s27_s30, 896  ;;  %p3238_p6 = scmp.lt.s32.totalorder %s27_s30, %s27_s30 }
  0x2d   :  { %p3234_p5 = scmp.ne.s32.totalorder %s27_s30, %s3233_s11  ;;  %p3239_p7 = scmp.lt.s32.totalorder %s3233_s11, %s3233_s11 }
  0x2f   :  { %p3240_p8 = por %p3239_p7, %p3238_p6 }
  0x31   :  { %p3241_p9 = pnand %p3240_p8, %p3234_p5 }
  0x33   :  { %3244 = shalt.err (!%p3241_p9)
}
  0x34   :  { %s3348_s5 = smov 448   ;;  %s3349_s23 = smov 28  }
  0x35   :  { %32 = dma.hbm_to_vmem [thread:$0]  %s3565_s0, 896, %s27_s30, [#allocation3], %s3348_s5, %s3348_s5, %s3349_s23  }
  0x36   :  { %s3350_s12 = smov [#allocation7]   ;;  %s3245_s17 = scalar_lea.hbm %s3568_s3, 2048 }
  0x37   :  { %s52_s13 = sshll.u32 %s3350_s12, 4  ;;  %p3246_p10 = scmp.ne.s32.totalorder %s3568_s3, %s3245_s17  ;;  %s53_s13 = int_to_ptr.vmem [resolvable:$true] %s52_s13 }
  0x38   :  { %p3249_p11 = scmp.lt.u32.totalorder %s3245_s17, %s3568_s3 }
  0x3a   :  { %p3251_p12 = pnand %p3249_p11, %p3246_p10 }
  0x3c   :  { %3254 = shalt.err (!%p3251_p12)
}
  0x3d   :  { %s3255_s20 = scalar_lea.vmem %s53_s13, 2048  ;;  %p3260_p0 = scmp.lt.s32.totalorder %s53_s13, %s53_s13 }
  0x3e   :  { %p3256_p13 = scmp.ne.s32.totalorder %s53_s13, %s3255_s20  ;;  %p3261_p1 = scmp.lt.s32.totalorder %s3255_s20, %s3255_s20 }
  0x40   :  { %p3262_p2 = por %p3261_p1, %p3260_p0 }
  0x42   :  { %p3263_p3 = pnand %p3262_p2, %p3256_p13 }
  0x44   :  { %3266 = shalt.err (!%p3263_p3)
}
  0x45   :  { %s3351_s0 = smov 64   ;;  %s3352_s30 = smov 4  }
  0x46   :  { %58 = dma.hbm_to_vmem [thread:$0]  %s3568_s3, 2048, %s53_s13, [#allocation6], %s3351_s0, %s3351_s0, %s3352_s30  }
  0x47   :  { %s3353_s25 = smov [#allocation10]   ;;  %s3267_s11 = scalar_lea.hbm %s3572_s7, 14336 }
  0x48   :  { %s80_s26 = sshll.u32 %s3353_s25, 4  ;;  %p3268_p4 = scmp.ne.s32.totalorder %s3572_s7, %s3267_s11  ;;  %s81_s26 = int_to_ptr.vmem [resolvable:$true] %s80_s26 }
  0x49   :  { %p3271_p5 = scmp.lt.u32.totalorder %s3267_s11, %s3572_s7 }
  0x4b   :  { %p3273_p6 = pnand %p3271_p5, %p3268_p4 }
  0x4d   :  { %3276 = shalt.err (!%p3273_p6)
}
  0x4e   :  { %s3277_s16 = scalar_lea.vmem %s81_s26, 14336  ;;  %p3282_p8 = scmp.lt.s32.totalorder %s81_s26, %s81_s26 }
  0x4f   :  { %p3278_p7 = scmp.ne.s32.totalorder %s81_s26, %s3277_s16  ;;  %p3283_p9 = scmp.lt.s32.totalorder %s3277_s16, %s3277_s16 }
  0x51   :  { %p3284_p10 = por %p3283_p9, %p3282_p8 }
  0x53   :  { %p3285_p11 = pnand %p3284_p10, %p3278_p7 }
  0x55   :  { %3288 = shalt.err (!%p3285_p11)
}
  0x56   :  { %86 = dma.hbm_to_vmem [thread:$0]  %s3572_s7, 14336, %s81_s26, [#allocation9], %s3348_s5, %s3348_s5, %s3349_s23  }
  0x57   :  { %3333 = dma.done.wait [#allocation3], 896  }
  0x58   :  { %3334 = vsyncadd [#allocation3], 4294966400 }
  0x59   :  { %3335 = dma.done.wait [#allocation6], 16384  }
  0x5a   :  { %3336 = vsyncadd [#allocation6], 4294950912 }
  0x5b   :  { %3337 = dma.done.wait [#allocation9], 16384  }
  0x5c   :  { %3338 = vsyncadd [#allocation9], 4294950912  ;;  %v2773_v0 = vld [vmem:[#allocation5 + $0x4] ss:$8 sps:$4 sm:$0xff]   ;;  %v2775_v1 = vld [vmem:[#allocation5] ss:$8 sps:$4 sm:$0xff]  }
  0x5d   :  { %833 = vmatprep.subr.bf16.mxu0 %v2773_v0  ;;  %v2776_v2 = vld [vmem:[#allocation5 + $0x14] ss:$8 sps:$4 sm:$0xff]   ;;  %v2778_v3 = vld [vmem:[#allocation5 + $0x10] ss:$8 sps:$4 sm:$0xff]   ;;  %v2779_v4 = vld [vmem:[#allocation5 + $0x24] ss:$8 sps:$4 sm:$0xff]  }
  0x5e   :  { %834 = vmatpush1.bf16.msra.mxu0 %v2775_v1  ;;  %v2781_v5 = vld [vmem:[#allocation5 + $0x20] ss:$8 sps:$4 sm:$0xff]   ;;  %v2782_v6 = vld [vmem:[#allocation5 + $0x34] ss:$8 sps:$4 sm:$0xff]   ;;  %v2784_v7 = vld [vmem:[#allocation5 + $0x30] ss:$8 sps:$4 sm:$0xff]  }
  0x5f   :  { %835 = vmatprep.subr.bf16.mxu0 %v2776_v2  ;;  %v2785_v8 = vld [vmem:[#allocation5 + $0x44] ss:$8 sps:$4 sm:$0xff]   ;;  %v2787_v9 = vld [vmem:[#allocation5 + $0x40] ss:$8 sps:$4 sm:$0xff]   ;;  %v2788_v10 = vld [vmem:[#allocation5 + $0x54] ss:$8 sps:$4 sm:$0xff]  }
  0x60   :  { %v2790_v11 = vld [vmem:[#allocation5 + $0x50] ss:$8 sps:$4 sm:$0xff]   ;;  %v2791_v12 = vld [vmem:[#allocation5 + $0x64] ss:$8 sps:$4 sm:$0xff]   ;;  %v2793_v14 = vld [vmem:[#allocation5 + $0x60] ss:$8 sps:$4 sm:$0xff]  }
  0x61   :  { %v2823_v13 = vld [vmem:[#allocation2 + $0x4] ss:$28 sps:$4 sm:$0xff]   ;;  %v2794_v15 = vld [vmem:[#allocation5 + $0x74] ss:$8 sps:$4 sm:$0xff]   ;;  %v2796_v16 = vld [vmem:[#allocation5 + $0x70] ss:$8 sps:$4 sm:$0xff]  }
  0x62   :  { %836 = vmatpush1.bf16.msra.mxu0 %v2778_v3  ;;  %865 = vmatprep.mubr.bf16.mxu0 %v2823_v13  ;;  %v2797_v17 = vld [vmem:[#allocation5 + $0x84] ss:$8 sps:$4 sm:$0xff]   ;;  %v2799_v18 = vld [vmem:[#allocation5 + $0x80] ss:$8 sps:$4 sm:$0xff]   ;;  %v2800_v19 = vld [vmem:[#allocation5 + $0x94] ss:$8 sps:$4 sm:$0xff]  }
  0x63   :  { %837 = vmatprep.subr.bf16.mxu0 %v2779_v4  ;;  %v2802_v20 = vld [vmem:[#allocation5 + $0x90] ss:$8 sps:$4 sm:$0xff]   ;;  %v2803_v21 = vld [vmem:[#allocation5 + $0xa4] ss:$8 sps:$4 sm:$0xff]   ;;  %v2805_v22 = vld [vmem:[#allocation5 + $0xa0] ss:$8 sps:$4 sm:$0xff]  }
  0x64   :  { %v2806_v23 = vld [vmem:[#allocation5 + $0xb4] ss:$8 sps:$4 sm:$0xff]   ;;  %v2808_v24 = vld [vmem:[#allocation5 + $0xb0] ss:$8 sps:$4 sm:$0xff]   ;;  %v2809_v25 = vld [vmem:[#allocation5 + $0xc4] ss:$8 sps:$4 sm:$0xff]  }
  0x65   :  { %v2811_v26 = vld [vmem:[#allocation5 + $0xc0] ss:$8 sps:$4 sm:$0xff]   ;;  %v2812_v27 = vld [vmem:[#allocation5 + $0xd4] ss:$8 sps:$4 sm:$0xff]   ;;  %v2814_v28 = vld [vmem:[#allocation5 + $0xd0] ss:$8 sps:$4 sm:$0xff]  }
  0x66   :  { %838 = vmatpush1.bf16.msra.mxu0 %v2781_v5  ;;  %v2815_v29 = vld [vmem:[#allocation5 + $0xe4] ss:$8 sps:$4 sm:$0xff]   ;;  %v2817_v30 = vld [vmem:[#allocation5 + $0xe0] ss:$8 sps:$4 sm:$0xff]   ;;  %v2818_v31 = vld [vmem:[#allocation5 + $0xf4] ss:$8 sps:$4 sm:$0xff]  }
  0x67   :  { %839 = vmatprep.subr.bf16.mxu0 %v2782_v6  ;;  %v2820_v32 = vld [vmem:[#allocation5 + $0xf0] ss:$8 sps:$4 sm:$0xff]   ;;  %v2826_v33 = vld [vmem:[#allocation5 + $0x104] ss:$8 sps:$4 sm:$0xff]   ;;  %v2824_v35 = vld [vmem:[#allocation5 + $0x100] ss:$8 sps:$4 sm:$0xff]  }
  0x68   :  { %v2821_v34 = vld [vmem:[#allocation2] ss:$28 sps:$4 sm:$0xff]   ;;  %v2874_v36 = vld [vmem:[#allocation2 + $0xc] ss:$28 sps:$4 sm:$0xff]   ;;  %v2957_v0 = vld [vmem:[#allocation7 + $0x58] sm:$0xff]  }
  0x69   :  { %v2829_v37 = vld [vmem:[#allocation5 + $0x114] ss:$8 sps:$4 sm:$0xff]   ;;  %v2827_v38 = vld [vmem:[#allocation5 + $0x110] ss:$8 sps:$4 sm:$0xff]   ;;  %v2832_v39 = vld [vmem:[#allocation5 + $0x124] ss:$8 sps:$4 sm:$0xff]  }
  0x6a   :  { %840 = vmatpush1.bf16.msra.mxu0 %v2784_v7  ;;  %v2830_v40 = vld [vmem:[#allocation5 + $0x120] ss:$8 sps:$4 sm:$0xff]   ;;  %v2835_v41 = vld [vmem:[#allocation5 + $0x134] ss:$8 sps:$4 sm:$0xff]   ;;  %v2833_v42 = vld [vmem:[#allocation5 + $0x130] ss:$8 sps:$4 sm:$0xff]  }
  0x6b   :  { %841 = vmatprep.subr.bf16.mxu0 %v2785_v8  ;;  %v2838_v43 = vld [vmem:[#allocation5 + $0x144] ss:$8 sps:$4 sm:$0xff]   ;;  %v2836_v44 = vld [vmem:[#allocation5 + $0x140] ss:$8 sps:$4 sm:$0xff]   ;;  %v2841_v45 = vld [vmem:[#allocation5 + $0x154] ss:$8 sps:$4 sm:$0xff]  }
  0x6c   :  { %v2839_v46 = vld [vmem:[#allocation5 + $0x150] ss:$8 sps:$4 sm:$0xff]   ;;  %v2844_v47 = vld [vmem:[#allocation5 + $0x164] ss:$8 sps:$4 sm:$0xff]   ;;  %v2842_v48 = vld [vmem:[#allocation5 + $0x160] ss:$8 sps:$4 sm:$0xff]  }
  0x6d   :  { %v2847_v49 = vld [vmem:[#allocation5 + $0x174] ss:$8 sps:$4 sm:$0xff]   ;;  %v2845_v50 = vld [vmem:[#allocation5 + $0x170] ss:$8 sps:$4 sm:$0xff]   ;;  %v2850_v51 = vld [vmem:[#allocation5 + $0x184] ss:$8 sps:$4 sm:$0xff]  }
  0x6e   :  { %842 = vmatpush1.bf16.msra.mxu0 %v2787_v9  ;;  %v2848_v52 = vld [vmem:[#allocation5 + $0x180] ss:$8 sps:$4 sm:$0xff]   ;;  %v2853_v53 = vld [vmem:[#allocation5 + $0x194] ss:$8 sps:$4 sm:$0xff]   ;;  %v2851_v57 = vld [vmem:[#allocation5 + $0x190] ss:$8 sps:$4 sm:$0xff]  }
  0x6f   :  { %843 = vmatprep.subr.bf16.mxu0 %v2788_v10  ;;  %v2951_v54 = vld [vmem:[#allocation7 + $0x40] sm:$0xff]   ;;  %v2953_v56 = vld [vmem:[#allocation7 + $0x48] sm:$0xff]   ;;  %v2955_v61 = vld [vmem:[#allocation7 + $0x50] sm:$0xff]  }
  0x70   :  { %v2952_v55 = vld [vmem:[#allocation7] sm:$0xff]   ;;  %2699 = vmatprep.subr.bf16.mxu1 %v2951_v54  ;;  %v2954_v60 = vld [vmem:[#allocation7 + $0x8] sm:$0xff]   ;;  %v2859_v62 = vld [vmem:[#allocation5 + $0x1b4] ss:$8 sps:$4 sm:$0xff]  }
  0x71   :  { %v2856_v58 = vld [vmem:[#allocation5 + $0x1a4] ss:$8 sps:$4 sm:$0xff]   ;;  %v2854_v59 = vld [vmem:[#allocation5 + $0x1a0] ss:$8 sps:$4 sm:$0xff]   ;;  %2700 = vmatpush3.bf16.msra.mxu1 %v2952_v55  ;;  %v2956_v63 = vld [vmem:[#allocation7 + $0x10] sm:$0xff]  }
  0x72   :  { %844 = vmatpush1.bf16.msra.mxu0 %v2790_v11  ;;  %2701 = vmatprep.subr.bf16.mxu1 %v2953_v56  ;;  %v2857_v1 = vld [vmem:[#allocation5 + $0x1b0] ss:$8 sps:$4 sm:$0xff]   ;;  %v2862_v2 = vld [vmem:[#allocation5 + $0x1c4] ss:$8 sps:$4 sm:$0xff]   ;;  %v2860_v5 = vld [vmem:[#allocation5 + $0x1c0] ss:$8 sps:$4 sm:$0xff]  }
  0x73   :  { %845 = vmatprep.subr.bf16.mxu0 %v2791_v12  ;;  %v2958_v3 = vld [vmem:[#allocation7 + $0x18] sm:$0xff]   ;;  %v2959_v4 = vld [vmem:[#allocation7 + $0x60] sm:$0xff]   ;;  %v2961_v8 = vld [vmem:[#allocation7 + $0x68] sm:$0xff]  }
  0x74   :  { %v2865_v6 = vld [vmem:[#allocation5 + $0x1d4] ss:$8 sps:$4 sm:$0xff]   ;;  %v2960_v7 = vld [vmem:[#allocation7 + $0x20] sm:$0xff]   ;;  %v2863_v9 = vld [vmem:[#allocation5 + $0x1d0] ss:$8 sps:$4 sm:$0xff]  }
  0x75   :  { %2702 = vmatpush3.bf16.msra.mxu1 %v2954_v60  ;;  %v2868_v10 = vld [vmem:[#allocation5 + $0x1e4] ss:$8 sps:$4 sm:$0xff]   ;;  %v2866_v11 = vld [vmem:[#allocation5 + $0x1e0] ss:$8 sps:$4 sm:$0xff]   ;;  %v2871_v12 = vld [vmem:[#allocation5 + $0x1f4] ss:$8 sps:$4 sm:$0xff]  }
  0x76   :  { %846 = vmatpush1.bf16.msra.mxu0 %v2793_v14  ;;  %2703 = vmatprep.subr.bf16.mxu1 %v2955_v61  ;;  %v2869_v13 = vld [vmem:[#allocation5 + $0x1f0] ss:$8 sps:$4 sm:$0xff]   ;;  %v2877_v14 = vld [vmem:[#allocation5 + $0x204] ss:$8 sps:$4 sm:$0xff]   ;;  %v2932_v55 = vld [vmem:[#allocation5 + $0x320] ss:$8 sps:$4 sm:$0xff]  }
  0x77   :  { %847 = vmatprep.subr.bf16.mxu0 %v2794_v15  ;;  %v2872_v15 = vld [vmem:[#allocation2 + $0x8] ss:$28 sps:$4 sm:$0xff]   ;;  %v2937_v56 = vld [vmem:[#allocation5 + $0x334] ss:$8 sps:$4 sm:$0xff]  }
  0x78   :  { %v2934_v54 = vld [vmem:[#allocation5 + $0x324] ss:$8 sps:$4 sm:$0xff]   ;;  %v2943_v60 = vld [vmem:[#allocation5 + $0x354] ss:$8 sps:$4 sm:$0xff]   ;;  %v2941_v61 = vld [vmem:[#allocation5 + $0x350] ss:$8 sps:$4 sm:$0xff]  }
  0x79   :  { %2704 = vmatpush3.bf16.msra.mxu1 %v2956_v63  ;;  %v2944_v63 = vld [vmem:[#allocation5 + $0x360] ss:$8 sps:$4 sm:$0xff]  }
  0x7a   :  { %848 = vmatpush1.bf16.msra.mxu0 %v2796_v16  ;;  %2705 = vmatprep.subr.bf16.mxu1 %v2957_v0  ;;  %v2875_v16 = vld [vmem:[#allocation5 + $0x200] ss:$8 sps:$4 sm:$0xff]   ;;  %v2949_v0 = vld [vmem:[#allocation5 + $0x374] ss:$8 sps:$4 sm:$0xff]  }
  0x7b   :  { %849 = vmatprep.subr.bf16.mxu0 %v2797_v17  ;;  %v2925_v17 = vld [vmem:[#allocation2 + $0x14] ss:$28 sps:$4 sm:$0xff]  }
  0x7d   :  { %2706 = vmatpush3.bf16.msra.mxu1 %v2958_v3  ;;  %v2962_v3 = vld [vmem:[#allocation7 + $0x28] sm:$0xff]  }
  0x7e   :  { %850 = vmatpush1.bf16.msra.mxu0 %v2799_v18  ;;  %2707 = vmatprep.subr.bf16.mxu1 %v2959_v4  ;;  %v2880_v18 = vld [vmem:[#allocation5 + $0x214] ss:$8 sps:$4 sm:$0xff]  }
  0x7f   :  { %851 = vmatprep.subr.bf16.mxu0 %v2800_v19  ;;  %v2878_v19 = vld [vmem:[#allocation5 + $0x210] ss:$8 sps:$4 sm:$0xff]  }
  0x80   :  { %v2963_v4 = vld [vmem:[#allocation7 + $0x70] sm:$0xff]  }
  0x81   :  { %2708 = vmatpush3.bf16.msra.mxu1 %v2960_v7  ;;  %v2966_v7 = vld [vmem:[#allocation7 + $0x38] sm:$0xff]  }
  0x82   :  { %852 = vmatpush1.bf16.msra.mxu0 %v2802_v20  ;;  %2709 = vmatprep.subr.bf16.mxu1 %v2961_v8  ;;  %v2883_v20 = vld [vmem:[#allocation5 + $0x224] ss:$8 sps:$4 sm:$0xff]  }
  0x83   :  { %853 = vmatprep.subr.bf16.mxu0 %v2803_v21  ;;  %v2881_v21 = vld [vmem:[#allocation5 + $0x220] ss:$8 sps:$4 sm:$0xff]   ;;  %v2969_v8 = vld [vmem:[#allocation8 + $0x4] ss:$8 sps:$4 sm:$0xff]  }
  0x85   :  { %2710 = vmatpush3.bf16.msra.mxu1 %v2962_v3 }
  0x86   :  { %854 = vmatpush1.bf16.msra.mxu0 %v2805_v22  ;;  %v2886_v22 = vld [vmem:[#allocation5 + $0x234] ss:$8 sps:$4 sm:$0xff]   ;;  %2711 = vmatprep.subr.bf16.mxu1 %v2963_v4 }
  0x87   :  { %855 = vmatprep.subr.bf16.mxu0 %v2806_v23  ;;  %v2884_v23 = vld [vmem:[#allocation5 + $0x230] ss:$8 sps:$4 sm:$0xff]   ;;  %v2991_v4 = vld [vmem:[#allocation10] ss:$28 sps:$4 sm:$0xff]  }
  0x8a   :  { %856 = vmatpush1.bf16.msra.mxu0 %v2808_v24  ;;  %v2889_v24 = vld [vmem:[#allocation5 + $0x244] ss:$8 sps:$4 sm:$0xff]  }
  0x8b   :  { %857 = vmatprep.subr.bf16.mxu0 %v2809_v25  ;;  %v2887_v25 = vld [vmem:[#allocation5 + $0x240] ss:$8 sps:$4 sm:$0xff]  }
  0x8e   :  { %858 = vmatpush1.bf16.msra.mxu0 %v2811_v26  ;;  %v2892_v26 = vld [vmem:[#allocation5 + $0x254] ss:$8 sps:$4 sm:$0xff]  }
  0x8f   :  { %859 = vmatprep.subr.bf16.mxu0 %v2812_v27  ;;  %v2890_v27 = vld [vmem:[#allocation5 + $0x250] ss:$8 sps:$4 sm:$0xff]  }
  0x92   :  { %860 = vmatpush1.bf16.msra.mxu0 %v2814_v28  ;;  %v2895_v28 = vld [vmem:[#allocation5 + $0x264] ss:$8 sps:$4 sm:$0xff]  }
  0x93   :  { %861 = vmatprep.subr.bf16.mxu0 %v2815_v29  ;;  %v2893_v29 = vld [vmem:[#allocation5 + $0x260] ss:$8 sps:$4 sm:$0xff]  }
  0x96   :  { %862 = vmatpush1.bf16.msra.mxu0 %v2817_v30  ;;  %v2898_v30 = vld [vmem:[#allocation5 + $0x274] ss:$8 sps:$4 sm:$0xff]  }
  0x97   :  { %863 = vmatprep.subr.bf16.mxu0 %v2818_v31  ;;  %v2896_v31 = vld [vmem:[#allocation5 + $0x270] ss:$8 sps:$4 sm:$0xff]  }
  0x9a   :  { %864 = vmatpush1.bf16.msra.mxu0 %v2820_v32  ;;  %v2901_v32 = vld [vmem:[#allocation5 + $0x284] ss:$8 sps:$4 sm:$0xff]  }
  0x9b   :  { %876 = vmatprep.subr.bf16.mxu0 %v2826_v33  ;;  %v2899_v33 = vld [vmem:[#allocation5 + $0x280] ss:$8 sps:$4 sm:$0xff]  }
  0x9d   :  { %866 = vmatmul.mubr.bf16.vlgmr.msra.gmra.mrb[0].mxu0 %v2821_v34  ;;  %v2904_v34 = vld [vmem:[#allocation5 + $0x294] ss:$8 sps:$4 sm:$0xff]  }
  0x9e   :  { %877 = vmatpush1.bf16.msra.mxu0 %v2824_v35  ;;  %908 = vmatprep.mubr.bf16.mxu0 %v2874_v36  ;;  %v2902_v35 = vld [vmem:[#allocation5 + $0x290] ss:$8 sps:$4 sm:$0xff]   ;;  %v2907_v36 = vld [vmem:[#allocation5 + $0x2a4] ss:$8 sps:$4 sm:$0xff]  }
  0x9f   :  { %878 = vmatprep.subr.bf16.mxu0 %v2829_v37  ;;  %v2905_v37 = vld [vmem:[#allocation5 + $0x2a0] ss:$8 sps:$4 sm:$0xff]  }
  0xa2   :  { %879 = vmatpush1.bf16.msra.mxu0 %v2827_v38  ;;  %v2910_v38 = vld [vmem:[#allocation5 + $0x2b4] ss:$8 sps:$4 sm:$0xff]  }
  0xa3   :  { %880 = vmatprep.subr.bf16.mxu0 %v2832_v39  ;;  %v2908_v39 = vld [vmem:[#allocation5 + $0x2b0] ss:$8 sps:$4 sm:$0xff]  }
  0xa6   :  { %881 = vmatpush1.bf16.msra.mxu0 %v2830_v40  ;;  %v2913_v40 = vld [vmem:[#allocation5 + $0x2c4] ss:$8 sps:$4 sm:$0xff]  }
  0xa7   :  { %882 = vmatprep.subr.bf16.mxu0 %v2835_v41  ;;  %v2911_v41 = vld [vmem:[#allocation5 + $0x2c0] ss:$8 sps:$4 sm:$0xff]  }
  0xaa   :  { %883 = vmatpush1.bf16.msra.mxu0 %v2833_v42  ;;  %v2916_v42 = vld [vmem:[#allocation5 + $0x2d4] ss:$8 sps:$4 sm:$0xff]  }
  0xab   :  { %884 = vmatprep.subr.bf16.mxu0 %v2838_v43  ;;  %v2914_v43 = vld [vmem:[#allocation5 + $0x2d0] ss:$8 sps:$4 sm:$0xff]  }
  0xae   :  { %885 = vmatpush1.bf16.msra.mxu0 %v2836_v44  ;;  %v2919_v44 = vld [vmem:[#allocation5 + $0x2e4] ss:$8 sps:$4 sm:$0xff]  }
  0xaf   :  { %886 = vmatprep.subr.bf16.mxu0 %v2841_v45  ;;  %v2917_v45 = vld [vmem:[#allocation5 + $0x2e0] ss:$8 sps:$4 sm:$0xff]  }
  0xb2   :  { %887 = vmatpush1.bf16.msra.mxu0 %v2839_v46  ;;  %v2922_v46 = vld [vmem:[#allocation5 + $0x2f4] ss:$8 sps:$4 sm:$0xff]  }
  0xb3   :  { %888 = vmatprep.subr.bf16.mxu0 %v2844_v47  ;;  %v2920_v47 = vld [vmem:[#allocation5 + $0x2f0] ss:$8 sps:$4 sm:$0xff]  }
  0xb6   :  { %889 = vmatpush1.bf16.msra.mxu0 %v2842_v48  ;;  %v2928_v48 = vld [vmem:[#allocation5 + $0x304] ss:$8 sps:$4 sm:$0xff]  }
  0xb7   :  { %890 = vmatprep.subr.bf16.mxu0 %v2847_v49  ;;  %v2923_v49 = vld [vmem:[#allocation2 + $0x10] ss:$28 sps:$4 sm:$0xff]  }
  0xba   :  { %891 = vmatpush1.bf16.msra.mxu0 %v2845_v50  ;;  %v2926_v50 = vld [vmem:[#allocation5 + $0x300] ss:$8 sps:$4 sm:$0xff]  }
  0xbb   :  { %892 = vmatprep.subr.bf16.mxu0 %v2850_v51  ;;  %v2931_v51 = vld [vmem:[#allocation5 + $0x314] ss:$8 sps:$4 sm:$0xff]  }
  0xbe   :  { %893 = vmatpush1.bf16.msra.mxu0 %v2848_v52  ;;  %v2929_v52 = vld [vmem:[#allocation5 + $0x310] ss:$8 sps:$4 sm:$0xff]  }
  0xbf   :  { %894 = vmatprep.subr.bf16.mxu0 %v2853_v53  ;;  %v3354_v53 = vmov 0  }
  0xc2   :  { %895 = vmatpush1.bf16.msra.mxu0 %v2851_v57  ;;  %v2935_v57 = vld [vmem:[#allocation5 + $0x330] ss:$8 sps:$4 sm:$0xff]  }
  0xc3   :  { %896 = vmatprep.subr.bf16.mxu0 %v2856_v58  ;;  %v2940_v58 = vld [vmem:[#allocation5 + $0x344] ss:$8 sps:$4 sm:$0xff]  }
  0xc6   :  { %897 = vmatpush1.bf16.msra.mxu0 %v2854_v59  ;;  %v2938_v59 = vld [vmem:[#allocation5 + $0x340] ss:$8 sps:$4 sm:$0xff]  }
  0xc7   :  { %898 = vmatprep.subr.bf16.mxu0 %v2859_v62  ;;  %v2946_v62 = vld [vmem:[#allocation5 + $0x364] ss:$8 sps:$4 sm:$0xff]  }
  0xca   :  { %899 = vmatpush1.bf16.msra.mxu0 %v2857_v1  ;;  %v2947_v1 = vld [vmem:[#allocation5 + $0x370] ss:$8 sps:$4 sm:$0xff]  }
  0xcb   :  { %900 = vmatprep.subr.bf16.mxu0 %v2862_v2  ;;  %v2950_v2 = vld [vmem:[#allocation2 + $0x18] ss:$28 sps:$4 sm:$0xff]  }
  0xce   :  { %901 = vmatpush1.bf16.msra.mxu0 %v2860_v5  ;;  %v2964_v5 = vld [vmem:[#allocation7 + $0x30] sm:$0xff]  }
  0xcf   :  { %902 = vmatprep.subr.bf16.mxu0 %v2865_v6  ;;  %2712 = vmatpush3.bf16.msra.mxu1 %v2964_v5  ;;  %v2965_v6 = vld [vmem:[#allocation7 + $0x78] sm:$0xff]  }
  0xd0   :  { %2713 = vmatprep.subr.bf16.mxu1 %v2965_v6  ;;  %v2996_v6 = vld [vmem:[#allocation10 + $0x3c] ss:$28 sps:$4 sm:$0xff]  }
  0xd2   :  { %903 = vmatpush1.bf16.msra.mxu0 %v2863_v9  ;;  %v227_v9 = vlaneseq }
  0xd3   :  { %904 = vmatprep.subr.bf16.mxu0 %v2868_v10  ;;  %2714 = vmatpush3.bf16.msra.mxu1 %v2966_v7  ;;  %v2994_v7 = vld [vmem:[#allocation10 + $0x38] ss:$28 sps:$4 sm:$0xff]  }
  0xd4   :  { %1298 = vmatprep.subr.bf16.mxu1 %v2969_v8  ;;  %v3482_v10 = vshrl.u32 %v227_v9, 7  ;;  %v2999_v8 = vld [vmem:[#allocation10 + $0x74] ss:$28 sps:$4 sm:$0xff]  }
  0xd5   :  { %v2997_v9 = vld [vmem:[#allocation10 + $0x70] ss:$28 sps:$4 sm:$0xff]  }
  0xd6   :  { %905 = vmatpush1.bf16.msra.mxu0 %v2866_v11  ;;  %v3485_v11 = vsub.s32 0, %v3482_v10 }
  0xd7   :  { %906 = vmatprep.subr.bf16.mxu0 %v2871_v12  ;;  %v225_v12 = vld [vmem:[%s3567_s2] sm:$0x3] }
  0xda   :  { %907 = vmatpush1.bf16.msra.mxu0 %v2869_v13  ;;  %v3491_v13 = vsub.s32 1, %v3482_v10 }
  0xdb   :  { %919 = vmatprep.subr.bf16.mxu0 %v2877_v14  ;;  %v230_v14 = vrot.slane %v225_v12, %v3485_v11 }
  0xdd   :  { %909 = vmatmul.mubr.bf16.vlgmr.msra.gmra.mrb[0].mxu0 %v2872_v15  ;;  %v234_v15 = vrot.slane %v225_v12, %v3491_v13  ;;  %v3002_v12 = vld [vmem:[#allocation10 + $0xac] ss:$28 sps:$4 sm:$0xff]  }
  0xde   :  { %920 = vmatpush1.bf16.msra.mxu0 %v2875_v16  ;;  %951 = vmatprep.mubr.bf16.mxu0 %v2925_v17 }
  0xdf   :  { %921 = vmatprep.subr.bf16.mxu0 %v2880_v18 }
  0xe2   :  { %922 = vmatpush1.bf16.msra.mxu0 %v2878_v19 }
  0xe3   :  { %923 = vmatprep.subr.bf16.mxu0 %v2883_v20 }
  0xe6   :  { %924 = vmatpush1.bf16.msra.mxu0 %v2881_v21 }
  0xe7   :  { %925 = vmatprep.subr.bf16.mxu0 %v2886_v22 }
  0xea   :  { %926 = vmatpush1.bf16.msra.mxu0 %v2884_v23 }
  0xeb   :  { %927 = vmatprep.subr.bf16.mxu0 %v2889_v24 }
  0xee   :  { %928 = vmatpush1.bf16.msra.mxu0 %v2887_v25 }
  0xef   :  { %929 = vmatprep.subr.bf16.mxu0 %v2892_v26 }
  0xf2   :  { %930 = vmatpush1.bf16.msra.mxu0 %v2890_v27 }
  0xf3   :  { %931 = vmatprep.subr.bf16.mxu0 %v2895_v28 }
  0xf6   :  { %932 = vmatpush1.bf16.msra.mxu0 %v2893_v29 }
  0xf7   :  { %933 = vmatprep.subr.bf16.mxu0 %v2898_v30  ;;  %v2967_v30 = vld [vmem:[#allocation8] ss:$8 sps:$4 sm:$0xff]  }
  0xfa   :  { %934 = vmatpush1.bf16.msra.mxu0 %v2896_v31  ;;  %v2972_v31 = vld [vmem:[#allocation8 + $0x14] ss:$8 sps:$4 sm:$0xff]  }
  0xfb   :  { %935 = vmatprep.subr.bf16.mxu0 %v2901_v32  ;;  %v2970_v32 = vld [vmem:[#allocation8 + $0x10] ss:$8 sps:$4 sm:$0xff]  }
  0xfe   :  { %936 = vmatpush1.bf16.msra.mxu0 %v2899_v33  ;;  %v2975_v33 = vld [vmem:[#allocation8 + $0x24] ss:$8 sps:$4 sm:$0xff]  }
  0xff   :  { %937 = vmatprep.subr.bf16.mxu0 %v2904_v34  ;;  %v2973_v34 = vld [vmem:[#allocation8 + $0x20] ss:$8 sps:$4 sm:$0xff]  }
 0x102   :  { %938 = vmatpush1.bf16.msra.mxu0 %v2902_v35  ;;  %v2978_v35 = vld [vmem:[#allocation8 + $0x34] ss:$8 sps:$4 sm:$0xff]  }
 0x103   :  { %939 = vmatprep.subr.bf16.mxu0 %v2907_v36  ;;  %v2976_v36 = vld [vmem:[#allocation8 + $0x30] ss:$8 sps:$4 sm:$0xff]  }
 0x106   :  { %940 = vmatpush1.bf16.msra.mxu0 %v2905_v37  ;;  %v2981_v37 = vld [vmem:[#allocation8 + $0x44] ss:$8 sps:$4 sm:$0xff]  }
 0x107   :  { %941 = vmatprep.subr.bf16.mxu0 %v2910_v38  ;;  %v2979_v38 = vld [vmem:[#allocation8 + $0x40] ss:$8 sps:$4 sm:$0xff]  }
 0x10a   :  { %942 = vmatpush1.bf16.msra.mxu0 %v2908_v39  ;;  %v2984_v39 = vld [vmem:[#allocation8 + $0x54] ss:$8 sps:$4 sm:$0xff]  }
 0x10b   :  { %943 = vmatprep.subr.bf16.mxu0 %v2913_v40  ;;  %v2982_v40 = vld [vmem:[#allocation8 + $0x50] ss:$8 sps:$4 sm:$0xff]  }
 0x10e   :  { %944 = vmatpush1.bf16.msra.mxu0 %v2911_v41  ;;  %v2987_v41 = vld [vmem:[#allocation8 + $0x64] ss:$8 sps:$4 sm:$0xff]  }
 0x10f   :  { %945 = vmatprep.subr.bf16.mxu0 %v2916_v42  ;;  %v2985_v42 = vld [vmem:[#allocation8 + $0x60] ss:$8 sps:$4 sm:$0xff]  }
 0x112   :  { %946 = vmatpush1.bf16.msra.mxu0 %v2914_v43  ;;  %v2990_v43 = vld [vmem:[#allocation8 + $0x74] ss:$8 sps:$4 sm:$0xff]  }
 0x113   :  { %947 = vmatprep.subr.bf16.mxu0 %v2919_v44  ;;  %v2988_v44 = vld [vmem:[#allocation8 + $0x70] ss:$8 sps:$4 sm:$0xff]  }
 0x116   :  { %948 = vmatpush1.bf16.msra.mxu0 %v2917_v45  ;;  %v2993_v45 = vld [vmem:[#allocation10 + $0x4] ss:$28 sps:$4 sm:$0xff]  }
 0x117   :  { %949 = vmatprep.subr.bf16.mxu0 %v2922_v46  ;;  %v3018_v46 = vld [vmem:[#allocation10 + $0x1d8] ss:$28 sps:$4 sm:$0xff]  }
 0x11a   :  { %950 = vmatpush1.bf16.msra.mxu0 %v2920_v47  ;;  %v3019_v47 = vld [vmem:[#allocation10 + $0x18] ss:$28 sps:$4 sm:$0xff]  }
 0x11b   :  { %962 = vmatprep.subr.bf16.mxu0 %v2928_v48  ;;  %v3023_v48 = vld [vmem:[#allocation10 + $0x210] ss:$28 sps:$4 sm:$0xff]  }
 0x11d   :  { %952 = vmatmul.mubr.bf16.vlgmr.msra.gmra.mrb[0].mxu0 %v2923_v49  ;;  %v3024_v49 = vld [vmem:[#allocation10 + $0x50] ss:$28 sps:$4 sm:$0xff]  }
 0x11e   :  { %963 = vmatpush1.bf16.msra.mxu0 %v2926_v50  ;;  %994 = vmatprep.mubr.bf16.mxu0 %v3354_v53  ;;  %v3028_v50 = vld [vmem:[#allocation10 + $0x248] ss:$28 sps:$4 sm:$0xff]  }
 0x11f   :  { %964 = vmatprep.subr.bf16.mxu0 %v2931_v51  ;;  %v3029_v51 = vld [vmem:[#allocation10 + $0x88] ss:$28 sps:$4 sm:$0xff]  }
 0x122   :  { %965 = vmatpush1.bf16.msra.mxu0 %v2929_v52  ;;  %v3033_v52 = vld [vmem:[#allocation10 + $0x280] ss:$28 sps:$4 sm:$0xff]  }
 0x123   :  { %966 = vmatprep.subr.bf16.mxu0 %v2934_v54  ;;  %v3038_v54 = vld [vmem:[#allocation10 + $0x2b8] ss:$28 sps:$4 sm:$0xff]  }
 0x126   :  { %967 = vmatpush1.bf16.msra.mxu0 %v2932_v55  ;;  %v3039_v55 = vld [vmem:[#allocation10 + $0xf8] ss:$28 sps:$4 sm:$0xff]  }
 0x127   :  { %968 = vmatprep.subr.bf16.mxu0 %v2937_v56  ;;  %v3043_v56 = vld [vmem:[#allocation10 + $0x2f0] ss:$28 sps:$4 sm:$0xff]  }
 0x12a   :  { %969 = vmatpush1.bf16.msra.mxu0 %v2935_v57 }
 0x12b   :  { %970 = vmatprep.subr.bf16.mxu0 %v2940_v58  ;;  %v2529_v58 = vld [vmem:[%s3569_s4] ss:$0 sm:$0xff] }
 0x12e   :  { %971 = vmatpush1.bf16.msra.mxu0 %v2938_v59 }
 0x12f   :  { %972 = vmatprep.subr.bf16.mxu0 %v2943_v60 }
 0x132   :  { %973 = vmatpush1.bf16.msra.mxu0 %v2941_v61 }
 0x133   :  { %974 = vmatprep.subr.bf16.mxu0 %v2946_v62 }
 0x136   :  { %975 = vmatpush1.bf16.msra.mxu0 %v2944_v63 }
 0x137   :  { %976 = vmatprep.subr.bf16.mxu0 %v2949_v0 }
 0x13a   :  { %977 = vmatpush1.bf16.msra.mxu0 %v2947_v1 }
 0x13b   :  { %2721 = vmatprep.subr.bf16.mxu0 %v3018_v46 }
 0x13d   :  { %995 = vmatmul.mubr.bf16.vlgmr.msra.gmra.mrb[0].mxu0 %v2950_v2 }
 0x13e   :  { %2722 = vmatpush3.bf16.msra.mxu0 %v3019_v47 }
 0x13f   :  { %2723 = vmatprep.subr.bf16.mxu0 %v3023_v48 }
 0x142   :  { %2724 = vmatpush3.bf16.msra.mxu0 %v3024_v49 }
 0x143   :  { %2725 = vmatprep.subr.bf16.mxu0 %v3028_v50 }
 0x146   :  { %2726 = vmatpush3.bf16.msra.mxu0 %v3029_v51 }
 0x147   :  { %2727 = vmatprep.subr.bf16.mxu0 %v3033_v52 }
 0x210   :  { %v996_v16 = vpop.f32.mrb[0].mxu0 }
 0x211   :  { %v2743_v17 = vadd.f32 %v996_v16, %v230_v14  ;;  %v998_v18 = vpop.f32.mrb[1].mxu0  ;;  %v3003_v16 = vld [vmem:[#allocation10 + $0xe0] ss:$28 sps:$4 sm:$0xff]  }
 0x212   :  { %v2744_v19 = vadd.f32 %v998_v18, %v234_v15  ;;  %v1000_v20 = vpop.f32.mrb[2].mxu0  ;;  %v3006_v18 = vld [vmem:[#allocation10 + $0x118] ss:$28 sps:$4 sm:$0xff]  }
 0x213   :  { %v2745_v21 = vadd.f32 %v1000_v20, %v230_v14  ;;  %v1002_v22 = vpop.f32.mrb[3].mxu0  ;;  %v1005_v24 = vmax.f32 %v2743_v17, 0.0  ;;  %v3000_v14 = vld [vmem:[#allocation10 + $0xa8] ss:$28 sps:$4 sm:$0xff]   ;;  %v3008_v17 = vld [vmem:[#allocation10 + $0x11c] ss:$28 sps:$4 sm:$0xff]  }
 0x214   :  { %v2746_v23 = vadd.f32 %v1002_v22, %v234_v15  ;;  %v1006_v26 = vmax.f32 %v2744_v19, 0.0  ;;  %v3005_v15 = vld [vmem:[#allocation10 + $0xe4] ss:$28 sps:$4 sm:$0xff]   ;;  %v3011_v19 = vld [vmem:[#allocation10 + $0x154] ss:$28 sps:$4 sm:$0xff]  }
 0x215   :  { %v1007_v25 = vmax.f32 %v2745_v21, 0.0  ;;  %v3009_v20 = vld [vmem:[#allocation10 + $0x150] ss:$28 sps:$4 sm:$0xff]   ;;  %v3012_v22 = vld [vmem:[#allocation10 + $0x188] ss:$28 sps:$4 sm:$0xff]  }
 0x216   :  { %v1008_v27 = vmax.f32 %v2746_v23, 0.0  ;;  %v3014_v21 = vld [vmem:[#allocation10 + $0x18c] ss:$28 sps:$4 sm:$0xff]   ;;  %v3017_v23 = vld [vmem:[#allocation10 + $0x1c4] ss:$28 sps:$4 sm:$0xff]  }
 0x217   :  { %v1009_v28 = vpack.c.bf16 %v1007_v25, %v1005_v24  ;;  %v3015_v24 = vld [vmem:[#allocation10 + $0x1c0] ss:$28 sps:$4 sm:$0xff]  }
 0x218   :  { %v1010_v29 = vpack.c.bf16 %v1008_v27, %v1006_v26  ;;  %v3022_v25 = vld [vmem:[#allocation10 + $0x1fc] ss:$28 sps:$4 sm:$0xff]   ;;  %v3027_v27 = vld [vmem:[#allocation10 + $0x234] ss:$28 sps:$4 sm:$0xff]  }
 0x219   :  { %v3020_v26 = vld [vmem:[#allocation10 + $0x1f8] ss:$28 sps:$4 sm:$0xff]  }
 0x21a   :  { %1178 = vmatprep.mubr.bf16.mxu1 %v1010_v29  ;;  %v3032_v29 = vld [vmem:[#allocation10 + $0x26c] ss:$28 sps:$4 sm:$0xff]  }
 0x21b   :  { %1179 = vmatmul.mubr.bf16.vlgmr.msra.gmra.mrb[0].mxu1 %v1009_v28  ;;  %v3025_v28 = vld [vmem:[#allocation10 + $0x230] ss:$28 sps:$4 sm:$0xff]  }
 0x21c   :  { %1299 = vmatpush1.bf16.msra.mxu1 %v2967_v30  ;;  %1330 = vmatprep.mubr.bf16.mxu1 %v3354_v53  ;;  %v3034_v53 = vld [vmem:[#allocation10 + $0xc0] ss:$28 sps:$4 sm:$0xff]   ;;  %v3030_v30 = vld [vmem:[#allocation10 + $0x268] ss:$28 sps:$4 sm:$0xff]  }
 0x21d   :  { %1300 = vmatprep.subr.bf16.mxu1 %v2972_v31  ;;  %2728 = vmatpush3.bf16.msra.mxu0 %v3034_v53  ;;  %v3037_v31 = vld [vmem:[#allocation10 + $0x2a4] ss:$28 sps:$4 sm:$0xff]  }
 0x21e   :  { %2729 = vmatprep.subr.bf16.mxu0 %v3038_v54 }
 0x220   :  { %1301 = vmatpush1.bf16.msra.mxu1 %v2970_v32  ;;  %v3035_v32 = vld [vmem:[#allocation10 + $0x2a0] ss:$28 sps:$4 sm:$0xff]  }
 0x221   :  { %1302 = vmatprep.subr.bf16.mxu1 %v2975_v33  ;;  %2730 = vmatpush3.bf16.msra.mxu0 %v3039_v55  ;;  %v3042_v33 = vld [vmem:[#allocation10 + $0x2dc] ss:$28 sps:$4 sm:$0xff]  }
 0x222   :  { %2731 = vmatprep.subr.bf16.mxu0 %v3043_v56 }
 0x224   :  { %1303 = vmatpush1.bf16.msra.mxu1 %v2973_v34  ;;  %v3040_v34 = vld [vmem:[#allocation10 + $0x2d8] ss:$28 sps:$4 sm:$0xff]  }
 0x225   :  { %1304 = vmatprep.subr.bf16.mxu1 %v2978_v35  ;;  %v3044_v35 = vld [vmem:[#allocation10 + $0x130] ss:$28 sps:$4 sm:$0xff]  }
 0x226   :  { %2732 = vmatpush3.bf16.msra.mxu0 %v3044_v35  ;;  %v3106_v35 = vld [vmem:[#allocation10 + $0x48] ss:$28 sps:$4 sm:$0xff]  }
 0x228   :  { %1305 = vmatpush1.bf16.msra.mxu1 %v2976_v36  ;;  %v3047_v36 = vld [vmem:[#allocation10 + $0x314] ss:$28 sps:$4 sm:$0xff]  }
 0x229   :  { %1306 = vmatprep.subr.bf16.mxu1 %v2981_v37  ;;  %v3045_v37 = vld [vmem:[#allocation10 + $0x310] ss:$28 sps:$4 sm:$0xff]  }
 0x22c   :  { %1307 = vmatpush1.bf16.msra.mxu1 %v2979_v38  ;;  %v3048_v38 = vld [vmem:[#allocation10 + $0x328] ss:$28 sps:$4 sm:$0xff]  }
 0x22d   :  { %1308 = vmatprep.subr.bf16.mxu1 %v2984_v39  ;;  %v3049_v39 = vld [vmem:[#allocation10 + $0x168] ss:$28 sps:$4 sm:$0xff]   ;;  %2733 = vmatprep.subr.bf16.mxu0 %v3048_v38  ;;  %v3114_v38 = vld [vmem:[#allocation10 + $0xbc] ss:$28 sps:$4 sm:$0xff]  }
 0x22e   :  { %2734 = vmatpush3.bf16.msra.mxu0 %v3049_v39  ;;  %v3112_v39 = vld [vmem:[#allocation10 + $0xb8] ss:$28 sps:$4 sm:$0xff]  }
 0x230   :  { %1309 = vmatpush1.bf16.msra.mxu1 %v2982_v40  ;;  %v3052_v40 = vld [vmem:[#allocation10 + $0x34c] ss:$28 sps:$4 sm:$0xff]  }
 0x231   :  { %1310 = vmatprep.subr.bf16.mxu1 %v2987_v41  ;;  %v3050_v41 = vld [vmem:[#allocation10 + $0x348] ss:$28 sps:$4 sm:$0xff]  }
 0x234   :  { %1311 = vmatpush1.bf16.msra.mxu1 %v2985_v42  ;;  %v3053_v42 = vld [vmem:[#allocation10 + $0x360] ss:$28 sps:$4 sm:$0xff]  }
 0x235   :  { %1312 = vmatprep.subr.bf16.mxu1 %v2990_v43  ;;  %v3054_v43 = vld [vmem:[#allocation10 + $0x1a0] ss:$28 sps:$4 sm:$0xff]   ;;  %2735 = vmatprep.subr.bf16.mxu0 %v3053_v42  ;;  %v3120_v42 = vld [vmem:[#allocation10 + $0x12c] ss:$28 sps:$4 sm:$0xff]  }
 0x236   :  { %2736 = vmatpush3.bf16.msra.mxu0 %v3054_v43  ;;  %v3118_v43 = vld [vmem:[#allocation10 + $0x128] ss:$28 sps:$4 sm:$0xff]  }
 0x238   :  { %1313 = vmatpush1.bf16.msra.mxu1 %v2988_v44  ;;  %v3057_v44 = vld [vmem:[#allocation10 + $0xc] ss:$28 sps:$4 sm:$0xff]  }
 0x239   :  { %2088 = vmatprep.subr.bf16.mxu1 %v2993_v45  ;;  %v1206_v45 = vld [vmem:[%s3571_s6] sm:$0x3] }
 0x23a   :  { %v1211_v46 = vrot.slane %v1206_v45, %v3485_v11  ;;  %v1215_v47 = vrot.slane %v1206_v45, %v3491_v13  ;;  %v3121_v45 = vld [vmem:[#allocation10 + $0x160] ss:$28 sps:$4 sm:$0xff]  }
 0x2ee   :  { %v2715_v57 = vpop.f32.mrb[0].mxu1 }
 0x2ef   :  { %v2716_v59 = vpop.f32.mrb[1].mxu1 }
 0x2f0   :  { %v2717_v60 = vadd.f32 %v2716_v59, %v2715_v57  ;;  %v2718_v61 = vpop.f32.mrb[2].mxu1 }
 0x2f1   :  { %v2719_v62 = vpop.f32.mrb[3].mxu1 }
 0x2f2   :  { %v1181_v63 = vadd.f32 %v2717_v60, %v2529_v58  ;;  %v2720_v0 = vadd.f32 %v2719_v62, %v2718_v61  ;;  %v3055_v62 = vld [vmem:[#allocation10 + $0x8] ss:$28 sps:$4 sm:$0xff]  }
 0x2f4   :  { %v1184_v1 = vadd.f32 %v2720_v0, %v2529_v58  ;;  %v1187_v2 = vmax.f32 %v1181_v63, 0.0  ;;  %v3060_v63 = vld [vmem:[#allocation10 + $0x44] ss:$28 sps:$4 sm:$0xff]  }
 0x2f5   :  { %v3058_v0 = vld [vmem:[#allocation10 + $0x40] ss:$28 sps:$4 sm:$0xff]  }
 0x2f6   :  { %v1188_v3 = vmax.f32 %v1184_v1, 0.0  ;;  %v3063_v1 = vld [vmem:[#allocation10 + $0x7c] ss:$28 sps:$4 sm:$0xff]  }
 0x2f8   :  { %v1189_v5 = vpack.c.bf16 %v1188_v3, %v1187_v2  ;;  %v3061_v2 = vld [vmem:[#allocation10 + $0x78] ss:$28 sps:$4 sm:$0xff]  }
 0x2f9   :  { %v3066_v3 = vld [vmem:[#allocation10 + $0xb4] ss:$28 sps:$4 sm:$0xff]  }
 0x2fa   :  { %2698 = vst [vmem:[#allocation12] sm:$0xff] %v1189_v5   ;;  %1331 = vmatmul.mubr.bf16.vlgmr.msra.gmra.mrb[4].mxu1 %v1189_v5  ;;  %v3069_v5 = vld [vmem:[#allocation10 + $0xec] ss:$28 sps:$4 sm:$0xff]  }
 0x2fb   :  { %2089 = vmatpush1.bf16.msra.mxu1 %v2991_v4  ;;  %v3064_v4 = vld [vmem:[#allocation10 + $0xb0] ss:$28 sps:$4 sm:$0xff]  }
 0x2fc   :  { %2090 = vmatprep.subr.bf16.mxu1 %v2996_v6  ;;  %v3067_v6 = vld [vmem:[#allocation10 + $0xe8] ss:$28 sps:$4 sm:$0xff]  }
 0x2ff   :  { %2091 = vmatpush1.bf16.msra.mxu1 %v2994_v7  ;;  %v3072_v7 = vld [vmem:[#allocation10 + $0x124] ss:$28 sps:$4 sm:$0xff]  }
 0x300   :  { %2092 = vmatprep.subr.bf16.mxu1 %v2999_v8  ;;  %v3070_v8 = vld [vmem:[#allocation10 + $0x120] ss:$28 sps:$4 sm:$0xff]  }
 0x303   :  { %2093 = vmatpush1.bf16.msra.mxu1 %v2997_v9  ;;  %v3075_v9 = vld [vmem:[#allocation10 + $0x15c] ss:$28 sps:$4 sm:$0xff]  }
 0x304   :  { %2094 = vmatprep.subr.bf16.mxu1 %v3002_v12  ;;  %v3073_v12 = vld [vmem:[#allocation10 + $0x158] ss:$28 sps:$4 sm:$0xff]  }
 0x307   :  { %2095 = vmatpush1.bf16.msra.mxu1 %v3000_v14  ;;  %v3078_v14 = vld [vmem:[#allocation10 + $0x194] ss:$28 sps:$4 sm:$0xff]  }
 0x308   :  { %2096 = vmatprep.subr.bf16.mxu1 %v3005_v15  ;;  %v3076_v15 = vld [vmem:[#allocation10 + $0x190] ss:$28 sps:$4 sm:$0xff]  }
 0x30b   :  { %2097 = vmatpush1.bf16.msra.mxu1 %v3003_v16  ;;  %v3081_v16 = vld [vmem:[#allocation10 + $0x1cc] ss:$28 sps:$4 sm:$0xff]  }
 0x30c   :  { %2098 = vmatprep.subr.bf16.mxu1 %v3008_v17  ;;  %v3079_v17 = vld [vmem:[#allocation10 + $0x1c8] ss:$28 sps:$4 sm:$0xff]  }
 0x30f   :  { %2099 = vmatpush1.bf16.msra.mxu1 %v3006_v18  ;;  %v3084_v18 = vld [vmem:[#allocation10 + $0x204] ss:$28 sps:$4 sm:$0xff]  }
 0x310   :  { %2100 = vmatprep.subr.bf16.mxu1 %v3011_v19  ;;  %v3082_v19 = vld [vmem:[#allocation10 + $0x200] ss:$28 sps:$4 sm:$0xff]  }
 0x313   :  { %2101 = vmatpush1.bf16.msra.mxu1 %v3009_v20  ;;  %v3087_v20 = vld [vmem:[#allocation10 + $0x23c] ss:$28 sps:$4 sm:$0xff]  }
 0x314   :  { %2102 = vmatprep.subr.bf16.mxu1 %v3014_v21  ;;  %v3085_v21 = vld [vmem:[#allocation10 + $0x238] ss:$28 sps:$4 sm:$0xff]  }
 0x317   :  { %2103 = vmatpush1.bf16.msra.mxu1 %v3012_v22  ;;  %v3090_v22 = vld [vmem:[#allocation10 + $0x274] ss:$28 sps:$4 sm:$0xff]  }
 0x318   :  { %2104 = vmatprep.subr.bf16.mxu1 %v3017_v23  ;;  %v3088_v23 = vld [vmem:[#allocation10 + $0x270] ss:$28 sps:$4 sm:$0xff]  }
 0x31b   :  { %2105 = vmatpush1.bf16.msra.mxu1 %v3015_v24  ;;  %v3093_v24 = vld [vmem:[#allocation10 + $0x2ac] ss:$28 sps:$4 sm:$0xff]  }
 0x31c   :  { %2106 = vmatprep.subr.bf16.mxu1 %v3022_v25  ;;  %v3091_v25 = vld [vmem:[#allocation10 + $0x2a8] ss:$28 sps:$4 sm:$0xff]  }
 0x31f   :  { %2107 = vmatpush1.bf16.msra.mxu1 %v3020_v26  ;;  %v3096_v26 = vld [vmem:[#allocation10 + $0x2e4] ss:$28 sps:$4 sm:$0xff]  }
 0x320   :  { %2108 = vmatprep.subr.bf16.mxu1 %v3027_v27  ;;  %v3094_v27 = vld [vmem:[#allocation10 + $0x2e0] ss:$28 sps:$4 sm:$0xff]  }
 0x323   :  { %2109 = vmatpush1.bf16.msra.mxu1 %v3025_v28  ;;  %v3099_v28 = vld [vmem:[#allocation10 + $0x31c] ss:$28 sps:$4 sm:$0xff]  }
 0x324   :  { %2110 = vmatprep.subr.bf16.mxu1 %v3032_v29  ;;  %v3097_v29 = vld [vmem:[#allocation10 + $0x318] ss:$28 sps:$4 sm:$0xff]  }
 0x327   :  { %2111 = vmatpush1.bf16.msra.mxu1 %v3030_v30  ;;  %v3102_v30 = vld [vmem:[#allocation10 + $0x354] ss:$28 sps:$4 sm:$0xff]  }
 0x328   :  { %2112 = vmatprep.subr.bf16.mxu1 %v3037_v31  ;;  %v3100_v31 = vld [vmem:[#allocation10 + $0x350] ss:$28 sps:$4 sm:$0xff]  }
 0x32b   :  { %2113 = vmatpush1.bf16.msra.mxu1 %v3035_v32  ;;  %v3105_v32 = vld [vmem:[#allocation10 + $0x14] ss:$28 sps:$4 sm:$0xff]  }
 0x32c   :  { %2114 = vmatprep.subr.bf16.mxu1 %v3042_v33  ;;  %v3103_v33 = vld [vmem:[#allocation10 + $0x10] ss:$28 sps:$4 sm:$0xff]  }
 0x32f   :  { %2115 = vmatpush1.bf16.msra.mxu1 %v3040_v34  ;;  %v3108_v34 = vld [vmem:[#allocation10 + $0x4c] ss:$28 sps:$4 sm:$0xff]  }
 0x330   :  { %2116 = vmatprep.subr.bf16.mxu1 %v3047_v36  ;;  %v3111_v36 = vld [vmem:[#allocation10 + $0x84] ss:$28 sps:$4 sm:$0xff]  }
 0x333   :  { %2117 = vmatpush1.bf16.msra.mxu1 %v3045_v37  ;;  %v3109_v37 = vld [vmem:[#allocation10 + $0x80] ss:$28 sps:$4 sm:$0xff]  }
 0x334   :  { %2118 = vmatprep.subr.bf16.mxu1 %v3052_v40  ;;  %v3117_v40 = vld [vmem:[#allocation10 + $0xf4] ss:$28 sps:$4 sm:$0xff]  }
 0x337   :  { %2119 = vmatpush1.bf16.msra.mxu1 %v3050_v41  ;;  %v3115_v41 = vld [vmem:[#allocation10 + $0xf0] ss:$28 sps:$4 sm:$0xff]  }
 0x338   :  { %2131 = vmatprep.subr.bf16.mxu1 %v3057_v44  ;;  %v3123_v44 = vld [vmem:[#allocation10 + $0x164] ss:$28 sps:$4 sm:$0xff]  }
 0x3cd   :  { %v1332_v48 = vpop.f32.mrb[4].mxu1 }
 0x3ce   :  { %v1333_v49 = vadd.f32 %v1332_v48, %v1211_v46  ;;  %v1334_v50 = vpop.f32.mrb[5].mxu1  ;;  %v3129_v48 = vld [vmem:[#allocation10 + $0x1d4] ss:$28 sps:$4 sm:$0xff]  }
 0x3cf   :  { %v1335_v51 = vadd.f32 %v1334_v50, %v1215_v47  ;;  %v1336_v52 = vpop.f32.mrb[6].mxu1  ;;  %v3132_v50 = vld [vmem:[#allocation10 + $0x20c] ss:$28 sps:$4 sm:$0xff]  }
 0x3d0   :  { %v1337_v53 = vadd.f32 %v1336_v52, %v1211_v46  ;;  %v1338_v54 = vpop.f32.mrb[7].mxu1  ;;  %v1341_v56 = vmax.f32 %v1333_v49, 0.0  ;;  %v3126_v46 = vld [vmem:[#allocation10 + $0x19c] ss:$28 sps:$4 sm:$0xff]   ;;  %v3127_v49 = vld [vmem:[#allocation10 + $0x1d0] ss:$28 sps:$4 sm:$0xff]  }
 0x3d1   :  { %v1339_v55 = vadd.f32 %v1338_v54, %v1215_v47  ;;  %v1342_v58 = vmax.f32 %v1335_v51, 0.0  ;;  %v3124_v47 = vld [vmem:[#allocation10 + $0x198] ss:$28 sps:$4 sm:$0xff]   ;;  %v3130_v51 = vld [vmem:[#allocation10 + $0x208] ss:$28 sps:$4 sm:$0xff]  }
 0x3d2   :  { %v1343_v57 = vmax.f32 %v1337_v53, 0.0  ;;  %v3135_v52 = vld [vmem:[#allocation10 + $0x244] ss:$28 sps:$4 sm:$0xff]   ;;  %v3138_v54 = vld [vmem:[#allocation10 + $0x27c] ss:$28 sps:$4 sm:$0xff]  }
 0x3d3   :  { %v1344_v59 = vmax.f32 %v1339_v55, 0.0  ;;  %v3133_v53 = vld [vmem:[#allocation10 + $0x240] ss:$28 sps:$4 sm:$0xff]   ;;  %v3136_v55 = vld [vmem:[#allocation10 + $0x278] ss:$28 sps:$4 sm:$0xff]  }
 0x3d4   :  { %v3504_v60 = vpack.c.bf16 %v1343_v57, %v1341_v56  ;;  %v3141_v56 = vld [vmem:[#allocation10 + $0x2b4] ss:$28 sps:$4 sm:$0xff]  }
 0x3d5   :  { %v3506_v61 = vpack.c.bf16 %v1344_v59, %v1342_v58  ;;  %v3139_v57 = vld [vmem:[#allocation10 + $0x2b0] ss:$28 sps:$4 sm:$0xff]   ;;  %v3142_v59 = vld [vmem:[#allocation10 + $0x2e8] ss:$28 sps:$4 sm:$0xff]  }
 0x3d6   :  { %v3144_v58 = vld [vmem:[#allocation10 + $0x2ec] ss:$28 sps:$4 sm:$0xff]  }
 0x3d7   :  { %2120 = vmatprep.mubr.bf16.mxu1 %v3506_v61  ;;  %2249 = vmatprep.mubr.bf16.mxu0 %v3506_v61 }
 0x3d8   :  { %2121 = vmatmul.mubr.bf16.vlgmr.msra.gmra.mrb[8].mxu1 %v3504_v60  ;;  %2250 = vmatmul.mubr.bf16.vlgmr.msra.gmra.mrb[4].mxu0 %v3504_v60 }
 0x3d9   :  { %2132 = vmatpush1.bf16.msra.mxu1 %v3055_v62  ;;  %2163 = vmatprep.mubr.bf16.mxu1 %v3506_v61  ;;  %v3145_v62 = vld [vmem:[#allocation10 + $0x320] ss:$28 sps:$4 sm:$0xff]  }
 0x3da   :  { %2133 = vmatprep.subr.bf16.mxu1 %v3060_v63  ;;  %v3150_v63 = vld [vmem:[#allocation10 + $0x35c] ss:$28 sps:$4 sm:$0xff]  }
 0x3dd   :  { %2134 = vmatpush1.bf16.msra.mxu1 %v3058_v0  ;;  %v3148_v0 = vld [vmem:[#allocation10 + $0x358] ss:$28 sps:$4 sm:$0xff]  }
 0x3de   :  { %2135 = vmatprep.subr.bf16.mxu1 %v3063_v1  ;;  %v3519_v1 = vld [vmem:[%s3573_s8] sm:$0xff]  ;;  %s3355_s8 = smov [#allocation12]  }
 0x3df   :  { %s2392_s19 = sshll.u32 %s3355_s8, 4  ;;  %s2393_s19 = int_to_ptr.vmem [resolvable:$true] %s2392_s19 }
 0x3e0   :  { %s3289_s20 = scalar_lea.vmem %s2393_s19, 128  ;;  %p3294_p13 = scmp.lt.s32.totalorder %s2393_s19, %s2393_s19 }
 0x3e1   :  { %2136 = vmatpush1.bf16.msra.mxu1 %v3061_v2  ;;  %v1503_v2 = vsub.s32 6, %v3482_v10  ;;  %p3290_p12 = scmp.ne.s32.totalorder %s2393_s19, %s3289_s20  ;;  %p3295_p0 = scmp.lt.s32.totalorder %s3289_s20, %s3289_s20 }
 0x3e2   :  { %2137 = vmatprep.subr.bf16.mxu1 %v3066_v3  ;;  %v1480_v3 = vrot.slane %v3519_v1, %v3485_v11 }
 0x3e3   :  { %p3296_p1 = por %p3295_p0, %p3294_p13 }
 0x3e5   :  { %2138 = vmatpush1.bf16.msra.mxu1 %v3064_v4  ;;  %v1484_v4 = vrot.slane %v3519_v1, %v3491_v13  ;;  %p3297_p2 = pnand %p3296_p1, %p3290_p12 }
 0x3e6   :  { %2139 = vmatprep.subr.bf16.mxu1 %v3069_v5 }
 0x3e9   :  { %2140 = vmatpush1.bf16.msra.mxu1 %v3067_v6 }
 0x3ea   :  { %2141 = vmatprep.subr.bf16.mxu1 %v3072_v7  ;;  %v1504_v7 = vrot.slane %v3519_v1, %v1503_v2 }
 0x3ed   :  { %2142 = vmatpush1.bf16.msra.mxu1 %v3070_v8 }
 0x3ee   :  { %2143 = vmatprep.subr.bf16.mxu1 %v3075_v9 }
 0x3f1   :  { %2144 = vmatpush1.bf16.msra.mxu1 %v3073_v12 }
 0x3f2   :  { %2145 = vmatprep.subr.bf16.mxu1 %v3078_v14 }
 0x3f5   :  { %2146 = vmatpush1.bf16.msra.mxu1 %v3076_v15 }
 0x3f6   :  { %2147 = vmatprep.subr.bf16.mxu1 %v3081_v16 }
 0x3f9   :  { %2148 = vmatpush1.bf16.msra.mxu1 %v3079_v17 }
 0x3fa   :  { %2149 = vmatprep.subr.bf16.mxu1 %v3084_v18 }
 0x3fd   :  { %2150 = vmatpush1.bf16.msra.mxu1 %v3082_v19 }
 0x3fe   :  { %2151 = vmatprep.subr.bf16.mxu1 %v3087_v20 }
 0x401   :  { %2152 = vmatpush1.bf16.msra.mxu1 %v3085_v21 }
 0x402   :  { %2153 = vmatprep.subr.bf16.mxu1 %v3090_v22 }
 0x405   :  { %2154 = vmatpush1.bf16.msra.mxu1 %v3088_v23 }
 0x406   :  { %2155 = vmatprep.subr.bf16.mxu1 %v3093_v24 }
 0x409   :  { %2156 = vmatpush1.bf16.msra.mxu1 %v3091_v25 }
 0x40a   :  { %2157 = vmatprep.subr.bf16.mxu1 %v3096_v26 }
 0x40d   :  { %2158 = vmatpush1.bf16.msra.mxu1 %v3094_v27 }
 0x40e   :  { %2159 = vmatprep.subr.bf16.mxu1 %v3099_v28 }
 0x411   :  { %2160 = vmatpush1.bf16.msra.mxu1 %v3097_v29 }
 0x412   :  { %2161 = vmatprep.subr.bf16.mxu1 %v3102_v30 }
 0x415   :  { %2162 = vmatpush1.bf16.msra.mxu1 %v3100_v31 }
 0x416   :  { %2174 = vmatprep.subr.bf16.mxu1 %v3105_v32 }
 0x418   :  { %2164 = vmatmul.mubr.bf16.vlgmr.msra.gmra.mrb[12].mxu1 %v3504_v60 }
 0x419   :  { %2175 = vmatpush1.bf16.msra.mxu1 %v3103_v33  ;;  %2206 = vmatprep.mubr.bf16.mxu1 %v3506_v61  ;;  %v3147_v61 = vld [vmem:[#allocation10 + $0x324] ss:$28 sps:$4 sm:$0xff]  }
 0x41a   :  { %2176 = vmatprep.subr.bf16.mxu1 %v3108_v34 }
 0x41d   :  { %2177 = vmatpush1.bf16.msra.mxu1 %v3106_v35 }
 0x41e   :  { %2178 = vmatprep.subr.bf16.mxu1 %v3111_v36 }
 0x421   :  { %2179 = vmatpush1.bf16.msra.mxu1 %v3109_v37 }
 0x422   :  { %2180 = vmatprep.subr.bf16.mxu1 %v3114_v38 }
 0x425   :  { %2181 = vmatpush1.bf16.msra.mxu1 %v3112_v39 }
 0x426   :  { %2182 = vmatprep.subr.bf16.mxu1 %v3117_v40 }
 0x429   :  { %2183 = vmatpush1.bf16.msra.mxu1 %v3115_v41 }
 0x42a   :  { %2184 = vmatprep.subr.bf16.mxu1 %v3120_v42 }
 0x42d   :  { %2185 = vmatpush1.bf16.msra.mxu1 %v3118_v43 }
 0x42e   :  { %2186 = vmatprep.subr.bf16.mxu1 %v3123_v44 }
 0x431   :  { %2187 = vmatpush1.bf16.msra.mxu1 %v3121_v45 }
 0x432   :  { %2188 = vmatprep.subr.bf16.mxu1 %v3126_v46 }
 0x435   :  { %2189 = vmatpush1.bf16.msra.mxu1 %v3124_v47 }
 0x436   :  { %2190 = vmatprep.subr.bf16.mxu1 %v3129_v48 }
 0x439   :  { %2191 = vmatpush1.bf16.msra.mxu1 %v3127_v49 }
 0x43a   :  { %2192 = vmatprep.subr.bf16.mxu1 %v3132_v50 }
 0x43d   :  { %2193 = vmatpush1.bf16.msra.mxu1 %v3130_v51 }
 0x43e   :  { %2194 = vmatprep.subr.bf16.mxu1 %v3135_v52 }
 0x441   :  { %2195 = vmatpush1.bf16.msra.mxu1 %v3133_v53 }
 0x442   :  { %2196 = vmatprep.subr.bf16.mxu1 %v3138_v54 }
 0x445   :  { %2197 = vmatpush1.bf16.msra.mxu1 %v3136_v55 }
 0x446   :  { %2198 = vmatprep.subr.bf16.mxu1 %v3141_v56 }
 0x449   :  { %2199 = vmatpush1.bf16.msra.mxu1 %v3139_v57 }
 0x44a   :  { %2200 = vmatprep.subr.bf16.mxu1 %v3144_v58 }
 0x44d   :  { %2201 = vmatpush1.bf16.msra.mxu1 %v3142_v59 }
 0x44e   :  { %2202 = vmatprep.subr.bf16.mxu1 %v3147_v61 }
 0x451   :  { %2203 = vmatpush1.bf16.msra.mxu1 %v3145_v62 }
 0x452   :  { %2204 = vmatprep.subr.bf16.mxu1 %v3150_v63 }
 0x455   :  { %2205 = vmatpush1.bf16.msra.mxu1 %v3148_v0 }
 0x458   :  { %2207 = vmatmul.mubr.bf16.vlgmr.msra.gmra.mrb[16].mxu1 %v3504_v60 }
 0x4ab   :  { %v2122_v5 = vpop.f32.mrb[8].mxu1  ;;  %v2737_v6 = vpop.f32.mrb[4].mxu0 }
 0x4ac   :  { %v2123_v8 = vadd.f32 %v2122_v5, %v1480_v3  ;;  %v2124_v9 = vpop.f32.mrb[9].mxu1  ;;  %v2738_v60 = vpop.f32.mrb[5].mxu0 }
 0x4ad   :  { %v2125_v12 = vadd.f32 %v2124_v9, %v1484_v4  ;;  %v2739_v14 = vadd.f32 %v2738_v60, %v2737_v6  ;;  %v2126_v15 = vpop.f32.mrb[10].mxu1  ;;  %v2740_v16 = vpop.f32.mrb[6].mxu0 }
 0x4ae   :  { %v2258_v17 = vmul.f32 0.5, %v2123_v8  ;;  %v2127_v18 = vadd.f32 %v2126_v15, %v1480_v3  ;;  %v2128_v19 = vpop.f32.mrb[11].mxu1  ;;  %v2741_v20 = vpop.f32.mrb[7].mxu0 }
 0x4af   :  { %v2259_v21 = vmul.f32 0.5, %v2125_v12  ;;  %v2252_v11 = vadd.f32 %v2739_v14, %v1504_v7  ;;  %v2129_v22 = vadd.f32 %v2128_v19, %v1484_v4  ;;  %v2742_v23 = vadd.f32 %v2741_v20, %v2740_v16 }
 0x4b0   :  { %3151 = vtanh.f32 %v2258_v17  ;;  %v2265_v13 = vmul.f32 0.5, %v2127_v18 }
 0x4b1   :  { %3153 = vtanh.f32 %v2259_v21  ;;  %v2264_v24 = vmul.f32 0.5, %v2252_v11  ;;  %v2266_v25 = vmul.f32 0.5, %v2129_v22  ;;  %v2255_v26 = vadd.f32 %v2742_v23, %v1504_v7 }
 0x4b2   :  { %3155 = vtanh.f32 %v2265_v13 }
 0x4b3   :  { %3157 = vtanh.f32 %v2264_v24  ;;  %v2271_v27 = vmul.f32 0.5, %v2255_v26 }
 0x4b4   :  { %3159 = vtanh.f32 %v2266_v25 }
 0x4b5   :  { %3161 = vtanh.f32 %v2271_v27 }
 0x4ba   :  { %v3152_v28 = vpop.eup %3151 }
 0x4bb   :  { %v3154_v29 = vpop.eup %3153  ;;  %v2286_v30 = vmul.f32 0.5, %v3152_v28 }
 0x4bc   :  { %v3156_v31 = vpop.eup %3155  ;;  %v2287_v32 = vmul.f32 0.5, %v3154_v29 }
 0x4bd   :  { %v3158_v33 = vpop.eup %3157  ;;  %v2300_v34 = vadd.f32 0.5, %v2286_v30  ;;  %v2293_v35 = vmul.f32 0.5, %v3156_v31 }
 0x4be   :  { %v3160_v36 = vpop.eup %3159  ;;  %v2301_v37 = vadd.f32 0.5, %v2287_v32  ;;  %v2292_v38 = vmul.f32 0.5, %v3158_v33 }
 0x4bf   :  { %v3162_v39 = vpop.eup %3161  ;;  %v2307_v40 = vadd.f32 0.5, %v2293_v35  ;;  %v2294_v41 = vmul.f32 0.5, %v3160_v36 }
 0x4c0   :  { %v2684_v42 = vpack.c.bf16 %v2301_v37, %v2300_v34  ;;  %v2306_v43 = vadd.f32 0.5, %v2292_v38  ;;  %v2299_v44 = vmul.f32 0.5, %v3162_v39 }
 0x4c1   :  { %v2308_v45 = vadd.f32 0.5, %v2294_v41 }
 0x4c2   :  { %2358 = vst [vmem:[#allocation11] sm:$0xff] %v2684_v42  ;;  %v2687_v46 = vpack.c.bf16 %v2306_v43, %v2306_v43  ;;  %v2313_v47 = vadd.f32 0.5, %v2299_v44 }
 0x4c3   :  { %v2688_v48 = vpack.c.bf16 %v2308_v45, %v2307_v40 }
 0x4c4   :  { %2361 = vst [vmem:[#allocation11 + $0x18] sm:$0xf] %v2687_v46  ;;  %v2691_v49 = vpack.c.bf16 %v2313_v47, %v2313_v47 }
 0x4c5   :  { %2362 = vst [vmem:[#allocation11 + $0x1c] sm:$0xff] %v2688_v48 }
 0x4c6   :  { %3300 = shalt.err (!%p3297_p2)
}
 0x4c7   :  { %s3301_s25 = scalar_lea.hbm %s3575_s10, 128 }
 0x4c8   :  { %p3302_p3 = scmp.ne.s32.totalorder %s3575_s10, %s3301_s25  ;;  %p3305_p4 = scmp.lt.u32.totalorder %s3301_s25, %s3575_s10 }
 0x4ca   :  { %p3307_p5 = pnand %p3305_p4, %p3302_p3 }
 0x4cc   :  { %3310 = shalt.err (!%p3307_p5)
}
 0x4cd   :  { %2398 = dma.vmem_to_hbm [thread:$0]  %s2393_s19, 128, %s3575_s10, [#allocation13], %s3351_s0, %s3351_s0, %s3352_s30   ;;  %2365 = vst [vmem:[#allocation11 + $0x34] sm:$0xf] %v2691_v49  ;;  %v1487_v50 = vsub.s32 2, %v3482_v10  ;;  %v1491_v51 = vsub.s32 3, %v3482_v10 }
 0x4ce   :  { %v1495_v20 = vsub.s32 4, %v3482_v10  ;;  %v1499_v21 = vsub.s32 5, %v3482_v10  ;;  %s3356_s10 = smov [#allocation11]  }
 0x4cf   :  { %v1488_v52 = vrot.slane %v3519_v1, %v1487_v50  ;;  %v1492_v53 = vrot.slane %v3519_v1, %v1491_v51  ;;  %s2380_s0 = sshll.u32 %s3356_s10, 4  ;;  %s2381_s0 = int_to_ptr.vmem [resolvable:$true] %s2380_s0 }
 0x4d0   :  { %v1496_v11 = vrot.slane %v3519_v1, %v1495_v20  ;;  %v1500_v22 = vrot.slane %v3519_v1, %v1499_v21  ;;  %s3311_s30 = scalar_lea.vmem %s2381_s0, 896  ;;  %p3316_p7 = scmp.lt.s32.totalorder %s2381_s0, %s2381_s0 }
 0x4d1   :  { %p3312_p6 = scmp.ne.s32.totalorder %s2381_s0, %s3311_s30  ;;  %p3317_p8 = scmp.lt.s32.totalorder %s3311_s30, %s3311_s30 }
 0x4d3   :  { %p3318_p9 = por %p3317_p8, %p3316_p7 }
 0x4d5   :  { %p3319_p10 = pnand %p3318_p9, %p3312_p6 }
 0x4eb   :  { %v2165_v54 = vpop.f32.mrb[12].mxu1 }
 0x4ec   :  { %v2166_v55 = vadd.f32 %v2165_v54, %v1488_v52  ;;  %v2167_v56 = vpop.f32.mrb[13].mxu1 }
 0x4ed   :  { %v2168_v57 = vadd.f32 %v2167_v56, %v1492_v53  ;;  %v2169_v58 = vpop.f32.mrb[14].mxu1 }
 0x4ee   :  { %v2260_v59 = vmul.f32 0.5, %v2166_v55  ;;  %v2170_v61 = vadd.f32 %v2169_v58, %v1488_v52  ;;  %v2171_v62 = vpop.f32.mrb[15].mxu1 }
 0x4ef   :  { %v2261_v63 = vmul.f32 0.5, %v2168_v57  ;;  %v2172_v0 = vadd.f32 %v2171_v62, %v1492_v53 }
 0x4f0   :  { %3163 = vtanh.f32 %v2260_v59  ;;  %v2267_v2 = vmul.f32 0.5, %v2170_v61 }
 0x4f1   :  { %3165 = vtanh.f32 %v2261_v63  ;;  %v2268_v3 = vmul.f32 0.5, %v2172_v0 }
 0x4f2   :  { %3167 = vtanh.f32 %v2267_v2 }
 0x4f3   :  { %3169 = vtanh.f32 %v2268_v3 }
 0x4fa   :  { %v3164_v4 = vpop.eup %3163 }
 0x4fb   :  { %v3166_v5 = vpop.eup %3165  ;;  %v2288_v6 = vmul.f32 0.5, %v3164_v4 }
 0x4fc   :  { %v3168_v7 = vpop.eup %3167  ;;  %v2289_v8 = vmul.f32 0.5, %v3166_v5 }
 0x4fd   :  { %v3170_v9 = vpop.eup %3169  ;;  %v2302_v60 = vadd.f32 0.5, %v2288_v6  ;;  %v2295_v12 = vmul.f32 0.5, %v3168_v7 }
 0x4fe   :  { %v2303_v14 = vadd.f32 0.5, %v2289_v8  ;;  %v2296_v15 = vmul.f32 0.5, %v3170_v9 }
 0x4ff   :  { %v2309_v16 = vadd.f32 0.5, %v2295_v12 }
 0x500   :  { %v2685_v17 = vpack.c.bf16 %v2303_v14, %v2302_v60  ;;  %v2310_v18 = vadd.f32 0.5, %v2296_v15 }
 0x502   :  { %2359 = vst [vmem:[#allocation11 + $0x8] sm:$0xff] %v2685_v17  ;;  %v2689_v19 = vpack.c.bf16 %v2310_v18, %v2309_v16 }
 0x504   :  { %2363 = vst [vmem:[#allocation11 + $0x24] sm:$0xff] %v2689_v19 }
 0x52b   :  { %v2208_v23 = vpop.f32.mrb[16].mxu1 }
 0x52c   :  { %v2209_v13 = vadd.f32 %v2208_v23, %v1496_v11  ;;  %v2210_v24 = vpop.f32.mrb[17].mxu1 }
 0x52d   :  { %v2211_v25 = vadd.f32 %v2210_v24, %v1500_v22  ;;  %v2212_v26 = vpop.f32.mrb[18].mxu1 }
 0x52e   :  { %v2262_v27 = vmul.f32 0.5, %v2209_v13  ;;  %v2213_v28 = vadd.f32 %v2212_v26, %v1496_v11  ;;  %v2214_v29 = vpop.f32.mrb[19].mxu1 }
 0x52f   :  { %v2263_v30 = vmul.f32 0.5, %v2211_v25  ;;  %v2215_v31 = vadd.f32 %v2214_v29, %v1500_v22 }
 0x530   :  { %3171 = vtanh.f32 %v2262_v27  ;;  %v2269_v32 = vmul.f32 0.5, %v2213_v28 }
 0x531   :  { %3173 = vtanh.f32 %v2263_v30  ;;  %v2270_v33 = vmul.f32 0.5, %v2215_v31 }
 0x532   :  { %3175 = vtanh.f32 %v2269_v32 }
 0x533   :  { %3177 = vtanh.f32 %v2270_v33 }
 0x53a   :  { %v3172_v10 = vpop.eup %3171 }
 0x53b   :  { %v3174_v34 = vpop.eup %3173  ;;  %v2290_v35 = vmul.f32 0.5, %v3172_v10 }
 0x53c   :  { %v3176_v1 = vpop.eup %3175  ;;  %v2291_v36 = vmul.f32 0.5, %v3174_v34 }
 0x53d   :  { %v3178_v37 = vpop.eup %3177  ;;  %v2304_v38 = vadd.f32 0.5, %v2290_v35  ;;  %v2297_v39 = vmul.f32 0.5, %v3176_v1 }
 0x53e   :  { %v2305_v40 = vadd.f32 0.5, %v2291_v36  ;;  %v2298_v41 = vmul.f32 0.5, %v3178_v37 }
 0x53f   :  { %v2311_v42 = vadd.f32 0.5, %v2297_v39 }
 0x540   :  { %v2686_v43 = vpack.c.bf16 %v2305_v40, %v2304_v38  ;;  %v2312_v44 = vadd.f32 0.5, %v2298_v41 }
 0x542   :  { %2360 = vst [vmem:[#allocation11 + $0x10] sm:$0xff] %v2686_v43  ;;  %v2690_v45 = vpack.c.bf16 %v2312_v44, %v2311_v42 }
 0x544   :  { %2364 = vst [vmem:[#allocation11 + $0x2c] sm:$0xff] %v2690_v45 }
 0x545   :  { %3322 = shalt.err (!%p3319_p10)
}
 0x546   :  { %s3323_s16 = scalar_lea.hbm %s3574_s9, 896 }
 0x547   :  { %p3324_p11 = scmp.ne.s32.totalorder %s3574_s9, %s3323_s16  ;;  %p3327_p12 = scmp.lt.u32.totalorder %s3323_s16, %s3574_s9 }
 0x549   :  { %p3329_p13 = pnand %p3327_p12, %p3324_p11 }
 0x54b   :  { %3332 = shalt.err (!%p3329_p13)
}
 0x54c   :  { %2386 = dma.vmem_to_hbm [thread:$0]  %s2381_s0, 896, %s3574_s9, [#allocation4], %s3348_s5, %s3348_s5, %s3349_s23  }
 0x54d   :  { %3339 = dma.done.wait [#allocation4], 896  }
 0x54e   :  { %3340 = vsyncadd [#allocation4], 4294966400 }
 0x54f   :  { %3341 = dma.done.wait [#allocation13], 128  }
 0x550   :  { %3342 = vsyncadd [#allocation13], 4294967168 }
 0x551   :  { %2405 = vsyncpa [#allocation3], 1 }
 0x552   :  { %2406 = vsyncpa [#allocation6], 1 }
 0x553   :  { %2407 = vsyncpa [#allocation9], 1 }
 0x554   :  { %2408 = vsyncpa [#allocation4], 1 }
 0x555   :  { %2409 = vsyncpa [#allocation13], 1 }

</bundles_post_ra>
